<compile_context>
chip_gen: v6e
topology: v6e:2x2x1
jax: 0.10.0
libtpu: 0.0.40
codegen_flags: <defaults>
</compile_context>

<pallas_src>
import functools

import jax
import jax.numpy as jnp
from jax.experimental import pallas as pl
from jax.experimental.pallas import tpu as pltpu

IN_DIM = 500     # num_dim  (fc1 input width)
HID_DIM = 500    # dim2     (fc1 output width == fc2 input width)
_LANE = 128


def _round_up(x, m):
    return ((x + m - 1) // m) * m


def _simple5_kernel(lw_ref, s1_ref, s2_ref, ref_ref, w1_ref, b1_ref, w2_ref, o_ref):
    """One batch tile of the fused Simple5 forward.

    Block shapes:
      lw_ref  : [L, D]      f32  softmax(weight_layers) broadcast along lanes
      s*_ref  : [TB, L*D]   f32  layer l lives in lanes [l*D, (l+1)*D)
      w1_ref  : [D, H]           fc1 weight (in, out), bf16 by default
      b1_ref  : [1, H]      f32  fc1 bias
      w2_ref  : [1, H]      f32  fc2 weight as a row
      o_ref   : [1, TB]     f32  lane-dense, already-squeezed output
    """
    f32 = jnp.float32
    L, D = lw_ref.shape

    def layer_reduce(x_ref):
        # softmax-weighted sum over layers == torch.bmm(ewl, x).squeeze()
        acc = x_ref[:, 0:D].astype(f32) * lw_ref[0:1, :]
        for l in range(1, L):                            # L is static -> unrolled
            acc = acc + x_ref[:, l * D:(l + 1) * D].astype(f32) * lw_ref[l:l + 1, :]
        return acc                                       # [TB, D] f32

    s1r = layer_reduce(s1_ref)
    s2r = layer_reduce(s2_ref)
    rr = layer_reduce(ref_ref)

    x1 = s1r * rr
    x2 = s2r * rr

    w1 = w1_ref[...]                                     # bf16 by default -> MXU-native
    b1 = b1_ref[...].astype(f32)
    h1 = jnp.maximum(
        jnp.dot(x1.astype(w1.dtype), w1, preferred_element_type=f32) + b1, 0.0)
    h2 = jnp.maximum(
        jnp.dot(x2.astype(w1.dtype), w1, preferred_element_type=f32) + b1, 0.0)
    # TODO(synk): Dropout(0.5) is identity at inference; training-mode dropout
    # (pltpu.prng_random_bits mask + 2x scaling) intentionally not applied.

    # fc2 (HID -> 1) as a VPU multiply + lane reduction; bias cancels in out1-out2.
    w2 = w2_ref[...].astype(f32)                         # [1, H]
    o1 = jnp.sum(h1 * w2, axis=-1)                       # [TB]
    o2 = jnp.sum(h2 * w2, axis=-1)
    o_ref[...] = (o1 - o2).reshape(1, -1).astype(o_ref.dtype)


def simple5_forward(s1, s2, ref, params, *, mxu_dtype=jnp.bfloat16, block_b=256):
    """Pallas implementation of Simple5.forward.

    mxu_dtype: dtype of the fc1 matmul operands (activations are cast in-VMEM,
      only the small fc1 weight is cast in the wrapper).  bfloat16 (default)
      keeps the MXU at native rate on v5e/v6e/v7x; accumulation stays f32.
      Use jnp.float32 for full precision.
    """
    w_layers, w1, b1, w2, _b2 = params       # fc2 bias cancels in out1 - out2
    B, L, D = s1.shape
    assert s2.shape == (B, L, D) and ref.shape == (B, L, D)
    assert w_layers.shape == (L,), "self.num_layers == num_layers"
    assert D == IN_DIM and w1.shape == (IN_DIM, HID_DIM)
    assert b1.shape == (HID_DIM,) and w2.shape == (HID_DIM, 1)
    assert block_b % _LANE == 0
    H = HID_DIM

    # softmax(weight_layers): every row of sf(ewl) is identical, so compute it
    # once and broadcast each layer weight along the D lanes (tiny: L*D floats).
    lw = jax.nn.softmax(w_layers.astype(jnp.float32))                # [L]
    lw_rows = jnp.tile(lw.reshape(L, 1), (1, D)).astype(jnp.float32) # [L, D]

    # Row-major [B, L, D] -> [B, L*D] is a pure bitcast: no copy, no pad, no cast
    # of the big activations in HBM (the kernel reads the raw f32 data directly).
    def flat(x):
        return x.reshape(B, L * D)
    s1f, s2f, reff = flat(s1), flat(s2), flat(ref)

    w1k = w1.astype(mxu_dtype)                                       # [D, H]
    b1k = b1.reshape(1, H).astype(jnp.float32)
    w2k = w2.reshape(1, H).astype(jnp.float32)

    # Batch tiling: weights stay VMEM-resident across grid steps, activations are
    # double-buffered by the BlockSpec pipeline, and batch tiles are independent
    # ("parallel") so v7x can shard them across both TensorCores.
    TB = B if B <= block_b else block_b
    Bp = _round_up(B, TB)
    if Bp != B:                                                      # rare ragged case
        pad = ((0, Bp - B), (0, 0))
        s1f, s2f, reff = jnp.pad(s1f, pad), jnp.pad(s2f, pad), jnp.pad(reff, pad)

    out = pl.pallas_call(
        _simple5_kernel,
        out_shape=jax.ShapeDtypeStruct((1, Bp), jnp.float32),
        grid_spec=pltpu.PrefetchScalarGridSpec(
            num_scalar_prefetch=0,
            grid=(Bp // TB,),
            in_specs=[
                pl.BlockSpec((L, D), lambda i: (0, 0)),        # lw rows (resident)
                pl.BlockSpec((TB, L * D), lambda i: (i, 0)),   # s1
                pl.BlockSpec((TB, L * D), lambda i: (i, 0)),   # s2
                pl.BlockSpec((TB, L * D), lambda i: (i, 0)),   # ref
                pl.BlockSpec((D, H), lambda i: (0, 0)),        # w1     (resident)
                pl.BlockSpec((1, H), lambda i: (0, 0)),        # b1     (resident)
                pl.BlockSpec((1, H), lambda i: (0, 0)),        # w2 row (resident)
            ],
            # Lane-dense (1, Bp) output slab -> unmasked stores, no wrapper squeeze.
            out_specs=pl.BlockSpec((1, TB), lambda i: (0, i)),
        ),
        compiler_params=pltpu.CompilerParams(
            dimension_semantics=("parallel",),
            vmem_limit_bytes=32 * 1024 * 1024,   # safe on v5e/v6e/v7x; TB<=256 fits with margin
        ),
    )(lw_rows, s1f, s2f, reff, w1k, b1k, w2k)

    # torch `out.squeeze()` on [B, 1] -> [B]  (torch would give a 0-d tensor for B == 1).
    return out[0, :B]


def simple5_reference(s1, s2, ref, params, *, mxu_dtype=jnp.float32):
    """Pure-JAX reference (matches the kernel's casting when mxu_dtype=bfloat16)."""
    w_layers, w1, b1, w2, b2 = params
    lw = jax.nn.softmax(w_layers.astype(jnp.float32))

    def layer_reduce(x):
        return jnp.einsum("l,bld->bd", lw, x.astype(jnp.float32))

    s1r, s2r, rr = layer_reduce(s1), layer_reduce(s2), layer_reduce(ref)

    def mlp(x):
        h = jnp.dot(x.astype(mxu_dtype), w1.astype(mxu_dtype),
                    preferred_element_type=jnp.float32) + b1
        h = jnp.maximum(h, 0.0)                 # ReLU; Dropout(0.5) == identity (eval)
        return jnp.sum(h * w2[:, 0], axis=-1) + b2[0]

    return mlp(s1r * rr) - mlp(s2r * rr)        # [B]  (b2 cancels)


def init_params(key, num_layers=2):
    """Deterministic init: PyTorch Linear default bounds; weight_layers random
    (torch leaves it uninitialized)."""
    k0, k1, k2, k3, k4 = jax.random.split(key, 5)
    w_layers = jax.random.normal(k0, (num_layers,), jnp.float32)
    bound1 = 1.0 / (IN_DIM ** 0.5)
    bound2 = 1.0 / (HID_DIM ** 0.5)
    w1 = jax.random.uniform(k1, (IN_DIM, HID_DIM), jnp.float32, -bound1, bound1)
    b1 = jax.random.uniform(k2, (HID_DIM,), jnp.float32, -bound1, bound1)
    w2 = jax.random.uniform(k3, (HID_DIM, 1), jnp.float32, -bound2, bound2)
    b2 = jax.random.uniform(k4, (1,), jnp.float32, -bound2, bound2)
    return w_layers, w1, b1, w2, b2


if __name__ == "__main__":
    key = jax.random.PRNGKey(0)
    k1, k2, k3, kp = jax.random.split(key, 4)

    B, L = 8, 2
    s1 = jax.random.normal(k1, (B, L, IN_DIM), jnp.float32)    # sent embeddings
    s2 = jax.random.normal(k2, (B, L, IN_DIM), jnp.float32)
    ref = jax.random.normal(k3, (B, L, IN_DIM), jnp.float32)
    params = init_params(kp, num_layers=L)

    fwd_f32 = jax.jit(functools.partial(simple5_forward, mxu_dtype=jnp.float32))
    fwd_bf16 = jax.jit(simple5_forward)        # default: bf16 MXU operands, f32 accumulation

    # f32 MXU path vs pure-JAX reference.
    out_f32 = jax.block_until_ready(fwd_f32(s1, s2, ref, params))
    ref_f32 = simple5_reference(s1, s2, ref, params, mxu_dtype=jnp.float32)
    assert out_f32.shape == (B,)
    assert jnp.allclose(out_f32, ref_f32, atol=1e-2, rtol=1e-2), (out_f32, ref_f32)

    # bf16 MXU path (production default) vs precision-matched reference.
    out_bf16 = jax.block_until_ready(fwd_bf16(s1, s2, ref, params))
    ref_bf16 = simple5_reference(s1, s2, ref, params, mxu_dtype=jnp.bfloat16)
    assert out_bf16.shape == (B,)
    assert jnp.allclose(out_bf16, ref_bf16, atol=1e-2, rtol=1e-2), (out_bf16, ref_bf16)

    print("KERNEL_OK")
</pallas_src>

<mosaic_0001>
module attributes {stable_mosaic.version = 11 : i64} {
  func.func @_simple5_kernel(%arg0: i32, %arg1: memref<2x500xf32, #tpu.memory_space<vmem>>, %arg2: memref<8x1000xf32, #tpu.memory_space<vmem>>, %arg3: memref<8x1000xf32, #tpu.memory_space<vmem>>, %arg4: memref<8x1000xf32, #tpu.memory_space<vmem>>, %arg5: memref<500x500xf32, #tpu.memory_space<vmem>>, %arg6: memref<1x500xf32, #tpu.memory_space<vmem>>, %arg7: memref<1x500xf32, #tpu.memory_space<vmem>>, %arg8: memref<1x8xf32, #tpu.memory_space<vmem>>) attributes {dimension_semantics = [#tpu.dimension_semantics<parallel>], iteration_bounds = array<i64: 1>, scalar_prefetch = 0 : i64, scratch_operands = 0 : i64, tpu.core_type = #tpu.core_type<tc>, window_params = [{pipeline_mode = #tpu.pipeline_mode<synchronous>, transform_indices = @transform_0, window_bounds = array<i64: 2, 500>}, {transform_indices = @transform_1, window_bounds = array<i64: 8, 1000>}, {transform_indices = @transform_2, window_bounds = array<i64: 8, 1000>}, {transform_indices = @transform_3, window_bounds = array<i64: 8, 1000>}, {pipeline_mode = #tpu.pipeline_mode<synchronous>, transform_indices = @transform_4, window_bounds = array<i64: 500, 500>}, {pipeline_mode = #tpu.pipeline_mode<synchronous>, transform_indices = @transform_5, window_bounds = array<i64: 1, 500>}, {pipeline_mode = #tpu.pipeline_mode<synchronous>, transform_indices = @transform_6, window_bounds = array<i64: 1, 500>}, {transform_indices = @transform_7, window_bounds = array<i64: 1, 8>}]} {
    %c0 = arith.constant 0 : index
    %c0_0 = arith.constant 0 : index
    %0 = vector.load %arg2[%c0, %c0_0] : memref<8x1000xf32, #tpu.memory_space<vmem>>, vector<8x500xf32>
    %c0_1 = arith.constant 0 : index
    %c0_2 = arith.constant 0 : index
    %1 = vector.load %arg1[%c0_1, %c0_2] : memref<2x500xf32, #tpu.memory_space<vmem>>, vector<1x500xf32>
    %2 = vector.broadcast %1 : vector<1x500xf32> to vector<8x500xf32>
    %3 = arith.mulf %0, %2 : vector<8x500xf32>
    %c0_3 = arith.constant 0 : index
    %c500 = arith.constant 500 : index
    %4 = vector.load %arg2[%c0_3, %c500] : memref<8x1000xf32, #tpu.memory_space<vmem>>, vector<8x500xf32>
    %c1 = arith.constant 1 : index
    %c0_4 = arith.constant 0 : index
    %5 = vector.load %arg1[%c1, %c0_4] : memref<2x500xf32, #tpu.memory_space<vmem>>, vector<1x500xf32>
    %6 = vector.broadcast %5 : vector<1x500xf32> to vector<8x500xf32>
    %7 = arith.mulf %4, %6 : vector<8x500xf32>
    %8 = arith.addf %3, %7 : vector<8x500xf32>
    %c0_5 = arith.constant 0 : index
    %c0_6 = arith.constant 0 : index
    %9 = vector.load %arg3[%c0_5, %c0_6] : memref<8x1000xf32, #tpu.memory_space<vmem>>, vector<8x500xf32>
    %c0_7 = arith.constant 0 : index
    %c0_8 = arith.constant 0 : index
    %10 = vector.load %arg1[%c0_7, %c0_8] : memref<2x500xf32, #tpu.memory_space<vmem>>, vector<1x500xf32>
    %11 = vector.broadcast %10 : vector<1x500xf32> to vector<8x500xf32>
    %12 = arith.mulf %9, %11 : vector<8x500xf32>
    %c0_9 = arith.constant 0 : index
    %c500_10 = arith.constant 500 : index
    %13 = vector.load %arg3[%c0_9, %c500_10] : memref<8x1000xf32, #tpu.memory_space<vmem>>, vector<8x500xf32>
    %c1_11 = arith.constant 1 : index
    %c0_12 = arith.constant 0 : index
    %14 = vector.load %arg1[%c1_11, %c0_12] : memref<2x500xf32, #tpu.memory_space<vmem>>, vector<1x500xf32>
    %15 = vector.broadcast %14 : vector<1x500xf32> to vector<8x500xf32>
    %16 = arith.mulf %13, %15 : vector<8x500xf32>
    %17 = arith.addf %12, %16 : vector<8x500xf32>
    %c0_13 = arith.constant 0 : index
    %c0_14 = arith.constant 0 : index
    %18 = vector.load %arg4[%c0_13, %c0_14] : memref<8x1000xf32, #tpu.memory_space<vmem>>, vector<8x500xf32>
    %c0_15 = arith.constant 0 : index
    %c0_16 = arith.constant 0 : index
    %19 = vector.load %arg1[%c0_15, %c0_16] : memref<2x500xf32, #tpu.memory_space<vmem>>, vector<1x500xf32>
    %20 = vector.broadcast %19 : vector<1x500xf32> to vector<8x500xf32>
    %21 = arith.mulf %18, %20 : vector<8x500xf32>
    %c0_17 = arith.constant 0 : index
    %c500_18 = arith.constant 500 : index
    %22 = vector.load %arg4[%c0_17, %c500_18] : memref<8x1000xf32, #tpu.memory_space<vmem>>, vector<8x500xf32>
    %c1_19 = arith.constant 1 : index
    %c0_20 = arith.constant 0 : index
    %23 = vector.load %arg1[%c1_19, %c0_20] : memref<2x500xf32, #tpu.memory_space<vmem>>, vector<1x500xf32>
    %24 = vector.broadcast %23 : vector<1x500xf32> to vector<8x500xf32>
    %25 = arith.mulf %22, %24 : vector<8x500xf32>
    %26 = arith.addf %21, %25 : vector<8x500xf32>
    %27 = arith.mulf %8, %26 : vector<8x500xf32>
    %28 = arith.mulf %17, %26 : vector<8x500xf32>
    %c0_21 = arith.constant 0 : index
    %c0_22 = arith.constant 0 : index
    %29 = vector.load %arg5[%c0_21, %c0_22] : memref<500x500xf32, #tpu.memory_space<vmem>>, vector<500x500xf32>
    %c0_23 = arith.constant 0 : index
    %c0_24 = arith.constant 0 : index
    %30 = vector.load %arg6[%c0_23, %c0_24] : memref<1x500xf32, #tpu.memory_space<vmem>>, vector<1x500xf32>
    %cst = arith.constant dense<0.000000e+00> : vector<8x500xf32>
    %31 = tpu.matmul %27, %29, %cst {dimension_numbers = #tpu.dot_dimension_numbers<[1], [0], [0], [1], [0, 0, 1, 1], [], []>} : vector<8x500xf32>, vector<500x500xf32>, vector<8x500xf32> -> vector<8x500xf32>
    %32 = vector.broadcast %30 : vector<1x500xf32> to vector<8x500xf32>
    %33 = arith.addf %31, %32 : vector<8x500xf32>
    %cst_25 = arith.constant 0.000000e+00 : f32
    %34 = vector.broadcast %cst_25 : f32 to vector<8x500xf32>
    %35 = arith.maximumf %33, %34 : vector<8x500xf32>
    %cst_26 = arith.constant dense<0.000000e+00> : vector<8x500xf32>
    %36 = tpu.matmul %28, %29, %cst_26 {dimension_numbers = #tpu.dot_dimension_numbers<[1], [0], [0], [1], [0, 0, 1, 1], [], []>} : vector<8x500xf32>, vector<500x500xf32>, vector<8x500xf32> -> vector<8x500xf32>
    %37 = vector.broadcast %30 : vector<1x500xf32> to vector<8x500xf32>
    %38 = arith.addf %36, %37 : vector<8x500xf32>
    %cst_27 = arith.constant 0.000000e+00 : f32
    %39 = vector.broadcast %cst_27 : f32 to vector<8x500xf32>
    %40 = arith.maximumf %38, %39 : vector<8x500xf32>
    %c0_28 = arith.constant 0 : index
    %c0_29 = arith.constant 0 : index
    %41 = vector.load %arg7[%c0_28, %c0_29] : memref<1x500xf32, #tpu.memory_space<vmem>>, vector<1x500xf32>
    %42 = vector.broadcast %41 : vector<1x500xf32> to vector<8x500xf32>
    %43 = arith.mulf %35, %42 : vector<8x500xf32>
    %cst_30 = arith.constant dense<0.000000e+00> : vector<8xf32>
    %44 = vector.multi_reduction <add>, %43, %cst_30 [1] : vector<8x500xf32> to vector<8xf32>
    %45 = vector.broadcast %41 : vector<1x500xf32> to vector<8x500xf32>
    %46 = arith.mulf %40, %45 : vector<8x500xf32>
    %cst_31 = arith.constant dense<0.000000e+00> : vector<8xf32>
    %47 = vector.multi_reduction <add>, %46, %cst_31 [1] : vector<8x500xf32> to vector<8xf32>
    %48 = arith.subf %44, %47 : vector<8xf32>
    %49 = vector.shape_cast %48 : vector<8xf32> to vector<1x8xf32>
    %c0_32 = arith.constant 0 : index
    %c0_33 = arith.constant 0 : index
    %50 = vector.load %arg8[%c0_32, %c0_33] : memref<1x8xf32, #tpu.memory_space<vmem>>, vector<1x8xf32>
    tpu.vector_store %arg8[%c0_32, %c0_33], %49 {strides = array<i32>} : memref<1x8xf32, #tpu.memory_space<vmem>>, vector<1x8xf32>,
    return
  }
  func.func @transform_0(%arg0: i32) -> (i32, i32) {
    %c0_i32 = arith.constant 0 : i32
    %c0_i32_0 = arith.constant 0 : i32
    %c0_i32_1 = arith.constant 0 : i32
    return %c0_i32, %c0_i32_0 : i32, i32
  }
  func.func @transform_1(%arg0: i32) -> (i32, i32) {
    %c0_i32 = arith.constant 0 : i32
    %c0_i32_0 = arith.constant 0 : i32
    return %arg0, %c0_i32 : i32, i32
  }
  func.func @transform_2(%arg0: i32) -> (i32, i32) {
    %c0_i32 = arith.constant 0 : i32
    %c0_i32_0 = arith.constant 0 : i32
    return %arg0, %c0_i32 : i32, i32
  }
  func.func @transform_3(%arg0: i32) -> (i32, i32) {
    %c0_i32 = arith.constant 0 : i32
    %c0_i32_0 = arith.constant 0 : i32
    return %arg0, %c0_i32 : i32, i32
  }
  func.func @transform_4(%arg0: i32) -> (i32, i32) {
    %c0_i32 = arith.constant 0 : i32
    %c0_i32_0 = arith.constant 0 : i32
    %c0_i32_1 = arith.constant 0 : i32
    return %c0_i32, %c0_i32_0 : i32, i32
  }
  func.func @transform_5(%arg0: i32) -> (i32, i32) {
    %c0_i32 = arith.constant 0 : i32
    %c0_i32_0 = arith.constant 0 : i32
    %c0_i32_1 = arith.constant 0 : i32
    return %c0_i32, %c0_i32_0 : i32, i32
  }
  func.func @transform_6(%arg0: i32) -> (i32, i32) {
    %c0_i32 = arith.constant 0 : i32
    %c0_i32_0 = arith.constant 0 : i32
    %c0_i32_1 = arith.constant 0 : i32
    return %c0_i32, %c0_i32_0 : i32, i32
  }
  func.func @transform_7(%arg0: i32) -> (i32, i32) {
    %c0_i32 = arith.constant 0 : i32
    %c0_i32_0 = arith.constant 0 : i32
    return %c0_i32, %arg0 : i32, i32
  }
}

</mosaic_0001>

<bundles_post_ra>
// kernel: simple5_forward.1
= control target key start
LH: loop header
LB: loop body
LE: loop exit
PB: predicated region body
PF: predicated region fallthrough
CT: control target
= control target key end

     0   :  { %12 = vsyncpa [#allocation3], 0  ;;  %s2186_s0 = inlined_call_operand.vmem [shape: f32[2,500], index: 0, kind: input, shape index: {}]   ;;  %s2187_s1 = inlined_call_operand.vmem [shape: f32[8,1000], index: 1, kind: input, shape index: {}]   ;;  %s2188_s2 = inlined_call_operand.vmem [shape: f32[8,1000], index: 2, kind: input, shape index: {}]   ;;  %s2189_s3 = inlined_call_operand.vmem [shape: f32[8,1000], index: 3, kind: input, shape index: {}]   ;;  %s2190_s4 = inlined_call_operand.hbm [shape: f32[500,500], index: 4, kind: input, shape index: {}]   ;;  %s2191_s5 = inlined_call_operand.vmem [shape: f32[1,500], index: 5, kind: input, shape index: {}]   ;;  %s2192_s6 = inlined_call_operand.vmem [shape: f32[1,500], index: 6, kind: input, shape index: {}]   ;;  %s2193_s7 = inlined_call_operand.hbm [shape: f32[1,8], index: 7, kind: output, shape index: {}]  }
   0x1   :  { %13 = vsyncpa [#allocation4], 0  ;;  %s1358_s24 = smov [#allocation2]  }
   0x2   :  { %s27_s25 = sshll.u32 %s1358_s24, 4  ;;  %s28_s25 = int_to_ptr.vmem [resolvable:$true] %s27_s25 }
   0x3   :  { %s1322_s26 = scalar_lea.vmem %s28_s25, 32256  ;;  %p1327_p1 = scmp.lt.s32.totalorder %s28_s25, %s28_s25 }
   0x4   :  { %p1323_p0 = scmp.ne.s32.totalorder %s28_s25, %s1322_s26  ;;  %p1328_p2 = scmp.lt.s32.totalorder %s1322_s26, %s1322_s26 }
   0x6   :  { %p1329_p3 = por %p1328_p2, %p1327_p1 }
   0x8   :  { %p1330_p4 = pnand %p1329_p3, %p1323_p0 }
   0xa   :  { %1333 = shalt.err (!%p1330_p4)
}
   0xb   :  { %s1359_s27 = smov 512   ;;  %s1360_s28 = smov 32  }
   0xc   :  { %33 = dma.hbm_to_vmem [thread:$0]  %s2190_s4, 32256, %s28_s25, [#allocation3], %s1359_s27, %s1359_s27, %s1360_s28  }
   0xd   :  { %1354 = dma.done.wait [#allocation3], 32256  }
   0xe   :  { %1355 = vsyncadd [#allocation3], 4294935040  ;;  %v2194_v0 = vlaneseq  ;;  %v1177_v6 = vld [vmem:[%s2186_s0 + $0x1] ss:$2 sm:$0xf]  ;;  %s1361_s9 = smov 116  }
   0xf   :  { %v429_v11 = vld [vmem:[#allocation2 + $0x5e8] sm:$0xff]  ;;  %v428_v12 = vld [vmem:[#allocation2 + $0x5e0] sm:$0xff]  ;;  %vm517_vm0 = vcmask 1043456   ;;  %vm102_vm1 = vcmask 949248   ;;  %s1362_s16 = smov 12   ;;  %vm131_vm2 = vcmask 97280  }
  0x10   :  { %v1408_v1 = vshrl.u32 %v2194_v0, 7  ;;  %v425_v13 = vld [vmem:[#allocation2 + $0x5c8] sm:$0xff]  ;;  %601 = vmatprep.subr.mxu1 %v429_v11  ;;  %v424_v14 = vld [vmem:[#allocation2 + $0x5c0] sm:$0xff]  ;;  %v1762_v0 = vld [vmem:[#allocation2 + $0x58] sm:$0xff]  ;;  %vm1160_vm3 = vcmask 57344  }
  0x11   :  { %602 = vmatpush1.msra.mxu1 %v428_v12  ;;  %v421_v15 = vld [vmem:[#allocation2 + $0x5a8] sm:$0xff]  ;;  %v300_v17 = vld [vmem:[#allocation2 + $0x1e0] sm:$0xff]  ;;  %2299 = vst [vmem:[#allocation18_spill] sm:$0xff] %v1762_v0 }
  0x12   :  { %2289 = vst [vmem:[#allocation8_spill] sm:$0xff] %v1408_v1  ;;  %v1411_v2 = vsub.s32 2, %v1408_v1  ;;  %v1414_v3 = vsub.s32 1, %v1408_v1  ;;  %v1417_v4 = vsub.s32 3, %v1408_v1  ;;  %v1420_v5 = vsub.s32 0, %v1408_v1  ;;  %v301_v16 = vld [vmem:[#allocation2 + $0x1e8] sm:$0xff]  ;;  %603 = vmatprep.subr.mxu1 %v425_v13 }
  0x13   :  { %v420_v18 = vld [vmem:[#allocation2 + $0x5a0] sm:$0xff]  ;;  %530 = vmatprep.subr.mxu0 %v301_v16  ;;  %v297_v19 = vld [vmem:[#allocation2 + $0x1c8] sm:$0xff]  ;;  %604 = vmatpush1.msra.mxu1 %v424_v14  ;;  %v1766_v1 = vld [vmem:[#allocation2 + $0x4d8] sm:$0xff] }
  0x14   :  { %2290 = vst [vmem:[#allocation9_spill] sm:$0xff] %v1411_v2  ;;  %2291 = vst [vmem:[#allocation10_spill] sm:$0xff] %v1414_v3  ;;  %v89_v7 = vrot.slane %v1177_v6, %v1411_v2  ;;  %v85_v8 = vrot.slane %v1177_v6, %v1414_v3  ;;  %v93_v9 = vrot.slane %v1177_v6, %v1417_v4  ;;  %v417_v20 = vld [vmem:[#allocation2 + $0x588] sm:$0xff]  ;;  %531 = vmatpush1.msra.mxu0 %v300_v17  ;;  %v296_v21 = vld [vmem:[#allocation2 + $0x1c0] sm:$0xff] }
  0x15   :  { %2292 = vst [vmem:[#allocation11_spill] sm:$0xff] %v1417_v4  ;;  %2293 = vst [vmem:[#allocation12_spill] sm:$0xff] %v1420_v5  ;;  %v81_v10 = vrot.slane %v1177_v6, %v1420_v5  ;;  %v293_v22 = vld [vmem:[#allocation2 + $0x1a8] sm:$0xff]  ;;  %605 = vmatprep.subr.mxu1 %v421_v15  ;;  %v416_v23 = vld [vmem:[#allocation2 + $0x580] sm:$0xff]  ;;  %532 = vmatprep.subr.mxu0 %v297_v19 }
  0x16   :  { %98 = vrot.lane.b32.xlu0 %v89_v7, %s1361_s9  ;;  %96 = vrot.lane.b32.xlu1 %v85_v8, %s1361_s9  ;;  %v292_v24 = vld [vmem:[#allocation2 + $0x1a0] sm:$0xff]  ;;  %v413_v25 = vld [vmem:[#allocation2 + $0x568] sm:$0xff]  ;;  %2300 = vst [vmem:[#allocation19_spill] sm:$0xff] %v1766_v1 }
  0x17   :  { %606 = vmatpush1.msra.mxu1 %v420_v18  ;;  %533 = vmatpush1.msra.mxu0 %v296_v21  ;;  %v289_v26 = vld [vmem:[#allocation2 + $0x188] sm:$0xff]  ;;  %v412_v27 = vld [vmem:[#allocation2 + $0x560] sm:$0xff] }
  0x18   :  { %607 = vmatprep.subr.mxu1 %v417_v20  ;;  %534 = vmatprep.subr.mxu0 %v293_v22  ;;  %v288_v28 = vld [vmem:[#allocation2 + $0x180] sm:$0xff]  ;;  %v409_v29 = vld [vmem:[#allocation2 + $0x548] sm:$0xff] }
  0x19   :  { %608 = vmatpush1.msra.mxu1 %v416_v23  ;;  %535 = vmatpush1.msra.mxu0 %v292_v24  ;;  %v285_v30 = vld [vmem:[#allocation2 + $0x168] sm:$0xff]  ;;  %v408_v31 = vld [vmem:[#allocation2 + $0x540] sm:$0xff] }
  0x1a   :  { %100 = vrot.lane.b32.xlu0 %v93_v9, %s1361_s9  ;;  %94 = vrot.lane.b32.xlu1 %v81_v10, %s1361_s9  ;;  %v284_v32 = vld [vmem:[#allocation2 + $0x160] sm:$0xff]  ;;  %v405_v33 = vld [vmem:[#allocation2 + $0x528] sm:$0xff] }
  0x1b   :  { %609 = vmatprep.subr.mxu1 %v413_v25  ;;  %536 = vmatprep.subr.mxu0 %v289_v26  ;;  %v281_v34 = vld [vmem:[#allocation2 + $0x148] sm:$0xff]  ;;  %v404_v35 = vld [vmem:[#allocation2 + $0x520] sm:$0xff] }
  0x1c   :  { %610 = vmatpush1.msra.mxu1 %v412_v27  ;;  %537 = vmatpush1.msra.mxu0 %v288_v28  ;;  %v280_v36 = vld [vmem:[#allocation2 + $0x140] sm:$0xff]  ;;  %v401_v37 = vld [vmem:[#allocation2 + $0x508] sm:$0xff] }
  0x1d   :  { %611 = vmatprep.subr.mxu1 %v409_v29  ;;  %538 = vmatprep.subr.mxu0 %v285_v30  ;;  %v277_v38 = vld [vmem:[#allocation2 + $0x128] sm:$0xff]  ;;  %v400_v39 = vld [vmem:[#allocation2 + $0x500] sm:$0xff] }
  0x1e   :  { %612 = vmatpush1.msra.mxu1 %v408_v31  ;;  %539 = vmatpush1.msra.mxu0 %v284_v32  ;;  %v276_v40 = vld [vmem:[#allocation2 + $0x120] sm:$0xff]  ;;  %v397_v41 = vld [vmem:[#allocation2 + $0x4e8] sm:$0xff] }
  0x1f   :  { %613 = vmatprep.subr.mxu1 %v405_v33  ;;  %540 = vmatprep.subr.mxu0 %v281_v34  ;;  %v273_v42 = vld [vmem:[#allocation2 + $0x108] sm:$0xff]  ;;  %v396_v43 = vld [vmem:[#allocation2 + $0x4e0] sm:$0xff] }
  0x20   :  { %614 = vmatpush1.msra.mxu1 %v404_v35  ;;  %541 = vmatpush1.msra.mxu0 %v280_v36  ;;  %v272_v44 = vld [vmem:[#allocation2 + $0x100] sm:$0xff]  ;;  %v393_v45 = vld [vmem:[#allocation2 + $0x4c8] sm:$0xff] }
  0x21   :  { %615 = vmatprep.subr.mxu1 %v401_v37  ;;  %542 = vmatprep.subr.mxu0 %v277_v38  ;;  %v269_v46 = vld [vmem:[#allocation2 + $0xe8] sm:$0xff]  ;;  %v392_v47 = vld [vmem:[#allocation2 + $0x4c0] sm:$0xff] }
  0x22   :  { %616 = vmatpush1.msra.mxu1 %v400_v39  ;;  %543 = vmatpush1.msra.mxu0 %v276_v40  ;;  %v268_v48 = vld [vmem:[#allocation2 + $0xe0] sm:$0xff]  ;;  %v389_v49 = vld [vmem:[#allocation2 + $0x4a8] sm:$0xff] }
  0x23   :  { %617 = vmatprep.subr.mxu1 %v397_v41  ;;  %544 = vmatprep.subr.mxu0 %v273_v42  ;;  %v265_v50 = vld [vmem:[#allocation2 + $0xc8] sm:$0xff]  ;;  %v388_v51 = vld [vmem:[#allocation2 + $0x4a0] sm:$0xff] }
  0x24   :  { %618 = vmatpush1.msra.mxu1 %v396_v43  ;;  %545 = vmatpush1.msra.mxu0 %v272_v44  ;;  %v264_v52 = vld [vmem:[#allocation2 + $0xc0] sm:$0xff]  ;;  %v385_v53 = vld [vmem:[#allocation2 + $0x488] sm:$0xff] }
  0x25   :  { %619 = vmatprep.subr.mxu1 %v393_v45  ;;  %546 = vmatprep.subr.mxu0 %v269_v46  ;;  %v261_v54 = vld [vmem:[#allocation2 + $0xa8] sm:$0xff]  ;;  %v384_v55 = vld [vmem:[#allocation2 + $0x480] sm:$0xff] }
  0x26   :  { %620 = vmatpush1.msra.mxu1 %v392_v47  ;;  %547 = vmatpush1.msra.mxu0 %v268_v48  ;;  %v260_v56 = vld [vmem:[#allocation2 + $0xa0] sm:$0xff]  ;;  %v381_v57 = vld [vmem:[#allocation2 + $0x468] sm:$0xff] }
  0x27   :  { %621 = vmatprep.subr.mxu1 %v389_v49  ;;  %548 = vmatprep.subr.mxu0 %v265_v50  ;;  %v257_v58 = vld [vmem:[#allocation2 + $0x88] sm:$0xff]  ;;  %v380_v59 = vld [vmem:[#allocation2 + $0x460] sm:$0xff] }
  0x28   :  { %622 = vmatpush1.msra.mxu1 %v388_v51  ;;  %549 = vmatpush1.msra.mxu0 %v264_v52  ;;  %v256_v60 = vld [vmem:[#allocation2 + $0x80] sm:$0xff]  ;;  %v377_v61 = vld [vmem:[#allocation2 + $0x448] sm:$0xff] }
  0x29   :  { %623 = vmatprep.subr.mxu1 %v385_v53  ;;  %550 = vmatprep.subr.mxu0 %v261_v54  ;;  %v253_v62 = vld [vmem:[#allocation2 + $0x68] sm:$0xff]  ;;  %v376_v63 = vld [vmem:[#allocation2 + $0x440] sm:$0xff] }
  0x2a   :  { %624 = vmatpush1.msra.mxu1 %v384_v55  ;;  %551 = vmatpush1.msra.mxu0 %v260_v56  ;;  %v252_v6 = vld [vmem:[#allocation2 + $0x60] sm:$0xff]  ;;  %v373_v7 = vld [vmem:[#allocation2 + $0x428] sm:$0xff] }
  0x2b   :  { %625 = vmatprep.subr.mxu1 %v381_v57  ;;  %552 = vmatprep.subr.mxu0 %v257_v58  ;;  %v249_v8 = vld [vmem:[#allocation2 + $0x48] sm:$0xff]  ;;  %v372_v9 = vld [vmem:[#allocation2 + $0x420] sm:$0xff] }
  0x2c   :  { %626 = vmatpush1.msra.mxu1 %v380_v59  ;;  %553 = vmatpush1.msra.mxu0 %v256_v60  ;;  %v248_v10 = vld [vmem:[#allocation2 + $0x40] sm:$0xff]  ;;  %v369_v11 = vld [vmem:[#allocation2 + $0x408] sm:$0xff] }
  0x2d   :  { %627 = vmatprep.subr.mxu1 %v377_v61  ;;  %554 = vmatprep.subr.mxu0 %v253_v62  ;;  %v245_v12 = vld [vmem:[#allocation2 + $0x28] sm:$0xff]  ;;  %v368_v13 = vld [vmem:[#allocation2 + $0x400] sm:$0xff]  ;;  %v74_v62 = vld [vmem:[%s2187_s1 + $0x38] sm:$0xff] }
  0x2e   :  { %628 = vmatpush1.msra.mxu1 %v376_v63  ;;  %555 = vmatpush1.msra.mxu0 %v252_v6  ;;  %v244_v14 = vld [vmem:[#allocation2 + $0x20] sm:$0xff]  ;;  %v489_v15 = vld [vmem:[#allocation2 + $0x7c8] sm:$0xf]  ;;  %v73_v63 = vld [vmem:[%s2187_s1 + $0x30] sm:$0xff] }
  0x2f   :  { %629 = vmatprep.subr.mxu1 %v373_v7  ;;  %556 = vmatprep.subr.mxu0 %v249_v8  ;;  %v241_v16 = vld [vmem:[#allocation2 + $0x8] sm:$0xff]  ;;  %v488_v17 = vld [vmem:[#allocation2 + $0x7c0] sm:$0xf] }
  0x30   :  { %630 = vmatpush1.msra.mxu1 %v372_v9  ;;  %557 = vmatpush1.msra.mxu0 %v248_v10  ;;  %v240_v18 = vld [vmem:[#allocation2] sm:$0xff]  ;;  %v485_v19 = vld [vmem:[#allocation2 + $0x7a8] sm:$0xff] }
  0x31   :  { %631 = vmatprep.subr.mxu1 %v369_v11  ;;  %558 = vmatprep.subr.mxu0 %v245_v12  ;;  %v365_v20 = vld [vmem:[#allocation2 + $0x3e8] sm:$0xff]  ;;  %v484_v21 = vld [vmem:[#allocation2 + $0x7a0] sm:$0xff] }
  0x32   :  { %632 = vmatpush1.msra.mxu1 %v368_v13  ;;  %559 = vmatpush1.msra.mxu0 %v244_v14  ;;  %v364_v22 = vld [vmem:[#allocation2 + $0x3e0] sm:$0xff]  ;;  %v481_v23 = vld [vmem:[#allocation2 + $0x788] sm:$0xff] }
  0x33   :  { %1178 = vmatprep.subr.msk.mxu1 %vm517_vm0, %v489_v15  ;;  %560 = vmatprep.subr.mxu0 %v241_v16  ;;  %v361_v24 = vld [vmem:[#allocation2 + $0x3c8] sm:$0xff]  ;;  %v480_v25 = vld [vmem:[#allocation2 + $0x780] sm:$0xff]  ;;  %v199_v15 = vld [vmem:[%s2189_s3 + $0x38] sm:$0xff] }
  0x34   :  { %1179 = vmatpush2.msk.msra.mxu1 %vm517_vm0, %v488_v17  ;;  %561 = vmatpush1.msra.mxu0 %v240_v18  ;;  %v360_v26 = vld [vmem:[#allocation2 + $0x3c0] sm:$0xff]  ;;  %v477_v27 = vld [vmem:[#allocation2 + $0x768] sm:$0xff] }
  0x35   :  { %637 = vmatprep.subr.mxu1 %v485_v19  ;;  %562 = vmatprep.subr.mxu0 %v365_v20  ;;  %v357_v28 = vld [vmem:[#allocation2 + $0x3a8] sm:$0xff]  ;;  %v476_v29 = vld [vmem:[#allocation2 + $0x760] sm:$0xff]  ;;  %v198_v19 = vld [vmem:[%s2189_s3 + $0x30] sm:$0xff] }
  0x36   :  { %638 = vmatpush2.msra.mxu1 %v484_v21  ;;  %563 = vmatpush2.msra.mxu0 %v364_v22  ;;  %v356_v30 = vld [vmem:[#allocation2 + $0x3a0] sm:$0xff]  ;;  %v473_v31 = vld [vmem:[#allocation2 + $0x748] sm:$0xff] }
  0x37   :  { %639 = vmatprep.subr.mxu1 %v481_v23  ;;  %564 = vmatprep.subr.mxu0 %v361_v24  ;;  %v353_v32 = vld [vmem:[#allocation2 + $0x388] sm:$0xff]  ;;  %v472_v33 = vld [vmem:[#allocation2 + $0x740] sm:$0xff] }
  0x38   :  { %640 = vmatpush2.msra.mxu1 %v480_v25  ;;  %565 = vmatpush2.msra.mxu0 %v360_v26  ;;  %v352_v34 = vld [vmem:[#allocation2 + $0x380] sm:$0xff]  ;;  %v469_v35 = vld [vmem:[#allocation2 + $0x728] sm:$0xff] }
  0x39   :  { %641 = vmatprep.subr.mxu1 %v477_v27  ;;  %566 = vmatprep.subr.mxu0 %v357_v28  ;;  %v349_v36 = vld [vmem:[#allocation2 + $0x368] sm:$0xff]  ;;  %v468_v37 = vld [vmem:[#allocation2 + $0x720] sm:$0xff] }
  0x3a   :  { %642 = vmatpush2.msra.mxu1 %v476_v29  ;;  %567 = vmatpush2.msra.mxu0 %v356_v30  ;;  %v348_v38 = vld [vmem:[#allocation2 + $0x360] sm:$0xff]  ;;  %v465_v39 = vld [vmem:[#allocation2 + $0x708] sm:$0xff]  ;;  %v1466_v29 = vld [vmem:[#allocation2 + $0x1f8] sm:$0xff] }
  0x3b   :  { %643 = vmatprep.subr.mxu1 %v473_v31  ;;  %568 = vmatprep.subr.mxu0 %v353_v32  ;;  %v345_v40 = vld [vmem:[#allocation2 + $0x348] sm:$0xff]  ;;  %v464_v41 = vld [vmem:[#allocation2 + $0x700] sm:$0xff] }
  0x3c   :  { %644 = vmatpush2.msra.mxu1 %v472_v33  ;;  %569 = vmatpush2.msra.mxu0 %v352_v34  ;;  %v461_v42 = vld [vmem:[#allocation2 + $0x6e8] sm:$0xff]  ;;  %v460_v43 = vld [vmem:[#allocation2 + $0x6e0] sm:$0xff] }
  0x3d   :  { %645 = vmatprep.subr.mxu1 %v469_v35  ;;  %570 = vmatprep.subr.mxu0 %v349_v36  ;;  %v457_v44 = vld [vmem:[#allocation2 + $0x6c8] sm:$0xff]  ;;  %v344_v45 = vld [vmem:[#allocation2 + $0x340] sm:$0xff] }
  0x3e   :  { %646 = vmatpush2.msra.mxu1 %v468_v37  ;;  %571 = vmatpush2.msra.mxu0 %v348_v38  ;;  %v456_v46 = vld [vmem:[#allocation2 + $0x6c0] sm:$0xff]  ;;  %v341_v47 = vld [vmem:[#allocation2 + $0x328] sm:$0xff]  ;;  %v147_v37 = vld [vmem:[%s2188_s2 + $0x18] sm:$0xff] }
  0x3f   :  { %647 = vmatprep.subr.mxu1 %v465_v39  ;;  %572 = vmatprep.subr.mxu0 %v345_v40  ;;  %v453_v48 = vld [vmem:[#allocation2 + $0x6a8] sm:$0xff]  ;;  %v340_v49 = vld [vmem:[#allocation2 + $0x320] sm:$0xff] }
  0x40   :  { %648 = vmatpush2.msra.mxu1 %v464_v41  ;;  %573 = vmatpush2.msra.mxu0 %v344_v45  ;;  %v452_v50 = vld [vmem:[#allocation2 + $0x6a0] sm:$0xff]  ;;  %v337_v51 = vld [vmem:[#allocation2 + $0x308] sm:$0xff] }
  0x41   :  { %649 = vmatprep.subr.mxu1 %v461_v42  ;;  %574 = vmatprep.subr.mxu0 %v341_v47  ;;  %v449_v52 = vld [vmem:[#allocation2 + $0x688] sm:$0xff]  ;;  %v336_v53 = vld [vmem:[#allocation2 + $0x300] sm:$0xff] }
  0x42   :  { %650 = vmatpush2.msra.mxu1 %v460_v43  ;;  %575 = vmatpush2.msra.mxu0 %v340_v49  ;;  %v448_v54 = vld [vmem:[#allocation2 + $0x680] sm:$0xff]  ;;  %v333_v56 = vld [vmem:[#allocation2 + $0x2e8] sm:$0xff] }
  0x43   :  { %651 = vmatprep.subr.mxu1 %v457_v44  ;;  %576 = vmatprep.subr.mxu0 %v337_v51  ;;  %v445_v57 = vld [vmem:[#allocation2 + $0x668] sm:$0xff]  ;;  %v332_v58 = vld [vmem:[#allocation2 + $0x2e0] sm:$0xff]  ;;  %v44_v51 = vld [vmem:[%s2187_s1 + $0x18] sm:$0xff] }
  0x44   :  { %652 = vmatpush2.msra.mxu1 %v456_v46  ;;  %577 = vmatpush2.msra.mxu0 %v336_v53  ;;  %v444_v59 = vld [vmem:[#allocation2 + $0x660] sm:$0xff]  ;;  %v329_v60 = vld [vmem:[#allocation2 + $0x2c8] sm:$0xff] }
  0x45   :  { %653 = vmatprep.subr.mxu1 %v453_v48  ;;  %578 = vmatprep.subr.mxu0 %v333_v56  ;;  %v441_v61 = vld [vmem:[#allocation2 + $0x648] sm:$0xff]  ;;  %v328_v6 = vld [vmem:[#allocation2 + $0x2c0] sm:$0xff]  ;;  %v1510_v48 = vld [vmem:[#allocation2 + $0x5f8] sm:$0xff] }
  0x46   :  { %654 = vmatpush2.msra.mxu1 %v452_v50  ;;  %579 = vmatpush2.msra.mxu0 %v332_v58  ;;  %v440_v7 = vld [vmem:[#allocation2 + $0x640] sm:$0xff]  ;;  %v325_v9 = vld [vmem:[#allocation2 + $0x2a8] sm:$0xff]  ;;  %v191_v50 = vld [vmem:[%s2189_s3 + $0x18] sm:$0xff] }
  0x47   :  { %655 = vmatprep.subr.mxu1 %v449_v52  ;;  %580 = vmatprep.subr.mxu0 %v329_v60  ;;  %v437_v10 = vld [vmem:[#allocation2 + $0x628] sm:$0xff]  ;;  %v324_v13 = vld [vmem:[#allocation2 + $0x2a0] sm:$0xff] }
  0x48   :  { %656 = vmatpush2.msra.mxu1 %v448_v54  ;;  %581 = vmatpush2.msra.mxu0 %v328_v6  ;;  %v436_v16 = vld [vmem:[#allocation2 + $0x620] sm:$0xff]  ;;  %v321_v17 = vld [vmem:[#allocation2 + $0x288] sm:$0xff]  ;;  %v155_v54 = vld [vmem:[%s2188_s2 + $0x38] sm:$0xff] }
  0x49   :  { %657 = vmatprep.subr.mxu1 %v445_v57  ;;  %582 = vmatprep.subr.mxu0 %v325_v9  ;;  %v433_v20 = vld [vmem:[#allocation2 + $0x608] sm:$0xff]  ;;  %v320_v21 = vld [vmem:[#allocation2 + $0x280] sm:$0xff] }
  0x4a   :  { %658 = vmatpush2.msra.mxu1 %v444_v59  ;;  %583 = vmatpush2.msra.mxu0 %v324_v13  ;;  %v432_v22 = vld [vmem:[#allocation2 + $0x600] sm:$0xff]  ;;  %v1459_v25 = vld [vmem:[#allocation2 + $0x268] sm:$0xff]  ;;  %v43_v13 = vld [vmem:[%s2187_s1 + $0x10] sm:$0xff] }
  0x4b   :  { %659 = vmatprep.subr.mxu1 %v441_v61  ;;  %v1457_v24 = vld [vmem:[%s2186_s0] ss:$2 sm:$0xf]  ;;  %584 = vmatprep.subr.mxu0 %v321_v17  ;;  %v197_v28 = vld [vmem:[%s2189_s3 + $0x28] sm:$0xff] }
  0x4c   :  { %660 = vmatpush2.msra.mxu1 %v440_v7  ;;  %585 = vmatpush2.msra.mxu0 %v320_v21  ;;  %v1468_v30 = vld [vmem:[#allocation2 + $0x260] sm:$0xff]  ;;  %v72_v32 = vld [vmem:[%s2187_s1 + $0x28] sm:$0xff]  ;;  %v62_v34 = vrot.slane %v1457_v24, %v1417_v4  ;;  %v1546_v7 = vrot.slane %v1457_v24, %v1411_v2  ;;  %v1559_v17 = vrot.slane %v1457_v24, %v1414_v3  ;;  %v1768_v4 = vld [vmem:[#allocation2 + $0x50] sm:$0xff] }
  0x4d   :  { %661 = vmatprep.subr.mxu1 %v437_v10  ;;  %v1474_v33 = vld [vmem:[#allocation2 + $0x248] sm:$0xff]  ;;  %586 = vmatprep.subr.mxu0 %v1459_v25  ;;  %v1480_v35 = vld [vmem:[#allocation2 + $0x240] sm:$0xff]  ;;  %v190_v10 = vld [vmem:[%s2189_s3 + $0x10] sm:$0xff]  ;;  %2301 = vst [vmem:[#allocation20_spill] sm:$0xff] %v1768_v4 }
  0x4e   :  { %662 = vmatpush2.msra.mxu1 %v436_v16  ;;  %587 = vmatpush2.msra.mxu0 %v1468_v30  ;;  %v1487_v38 = vld [vmem:[#allocation2 + $0x228] sm:$0xff]  ;;  %v196_v41 = vld [vmem:[%s2189_s3 + $0x20] sm:$0xff]  ;;  %v1496_v43 = vmul.f32 %v147_v37, %v62_v34  ;;  %v195_v9 = vmul.f32 %v191_v50, %v62_v34  ;;  %v194_v16 = vmul.f32 %v190_v10, %v1546_v7  ;;  %v1772_v2 = vld [vmem:[#allocation2 + $0x4d0] sm:$0xff] }
  0x4f   :  { %663 = vmatprep.subr.mxu1 %v433_v20  ;;  %588 = vmatprep.subr.mxu0 %v1474_v33  ;;  %v1494_v42 = vld [vmem:[#allocation2 + $0x220] sm:$0xff]  ;;  %v1503_v45 = vld [vmem:[#allocation2 + $0x208] sm:$0xff]  ;;  %v69_v20 = vmul.f32 %v1546_v7, %v43_v13  ;;  %v1625_v13 = vld [vmem:[#allocation2 + $0x178] sm:$0xff]  ;;  %2302 = vst [vmem:[#allocation21_spill] sm:$0xff] %v1772_v2 }
  0x50   :  { %664 = vmatpush2.msra.mxu1 %v432_v22  ;;  %v71_v44 = vld [vmem:[%s2187_s1 + $0x20] sm:$0xff]  ;;  %589 = vmatpush2.msra.mxu0 %v1480_v35  ;;  %v153_v59 = vld [vmem:[%s2188_s2 + $0x28] sm:$0xff]  ;;  %v1778_v3 = vld [vmem:[#allocation2 + $0x4b8] sm:$0xff] }
  0x51   :  { %672 = vmatprep.subr.mxu1 %v1466_v29  ;;  %590 = vmatprep.subr.mxu0 %v1487_v38  ;;  %v1507_v46 = vld [vmem:[#allocation2 + $0x200] sm:$0xff]  ;;  %v189_v21 = vld [vmem:[%s2189_s3 + $0x8] sm:$0xff]  ;;  %2304 = vst [vmem:[#allocation23_spill] sm:$0xff] %v1778_v3 }
  0x52   :  { %591 = vmatpush2.msra.mxu0 %v1494_v42  ;;  %v152_v58 = vld [vmem:[%s2188_s2 + $0x20] sm:$0xff] }
  0x53   :  { %592 = vmatprep.subr.mxu0 %v1503_v45 }
  0x54   :  { %593 = vmatpush2.msra.mxu0 %v1507_v46 }
  0x55   :  { %743 = vmatprep.subr.mxu0 %v1510_v48 }
  0x88   :  { %v99_v55 = vpop.permute.xlu0 %98  ;;  %v97_v18 = vpop.permute.xlu1 %96 }
  0x89   :  { %v104_v26 = vsel %vm102_vm1, %v97_v18, %v99_v55 }
  0x8a   :  { %v202_v36 = vmul.f32 %v197_v28, %v104_v26  ;;  %v113_v40 = vmul.f32 %v104_v26, %v72_v32  ;;  %v158_v61 = vmul.f32 %v153_v59, %v104_v26  ;;  %v1608_v59 = vld [vmem:[#allocation2 + $0x1b8] sm:$0xff] }
  0x8c   :  { %v1437_v8 = vpop.permute.xlu0 %100  ;;  %v95_v31 = vpop.permute.xlu1 %94 }
  0x8d   :  { %v1441_v11 = vsel %vm102_vm1, %v99_v55, %v1437_v8  ;;  %v115_v12 = vmul.f32 %v1437_v8, %v74_v62  ;;  %v204_v23 = vmul.f32 %v199_v15, %v1437_v8  ;;  %v103_v39 = vsel %vm102_vm1, %v95_v31, %v97_v18  ;;  %v154_v55 = vld [vmem:[%s2188_s2 + $0x30] sm:$0xff] }
  0x8e   :  { %v114_v14 = vmul.f32 %v1441_v11, %v73_v63  ;;  %v203_v27 = vmul.f32 %v198_v19, %v1441_v11  ;;  %v201_v47 = vmul.f32 %v196_v41, %v103_v39  ;;  %v112_v49 = vmul.f32 %v103_v39, %v71_v44  ;;  %v41_v44 = vld [vmem:[%s2187_s1] sm:$0xff] }
  0x8f   :  { %129 = vrot.lane.b32.xlu1 %v115_v12, %s1362_s16  ;;  %v200_v52 = vmul.f32 %v191_v50, %v95_v31  ;;  %v111_v53 = vmul.f32 %v95_v31, %v44_v51  ;;  %v160_v56 = vmul.f32 %v155_v54, %v1437_v8  ;;  %v159_v57 = vmul.f32 %v154_v55, %v1441_v11  ;;  %v1595_v50 = vld [vmem:[#allocation2 + $0x1f0] sm:$0xff]  ;;  %v1601_v54 = vld [vmem:[#allocation2 + $0x1d8] sm:$0xff] }
  0x90   :  { %127 = vrot.lane.b32.xlu0 %v114_v14, %s1362_s16  ;;  %v157_v60 = vmul.f32 %v152_v58, %v103_v39  ;;  %v156_v62 = vmul.f32 %v147_v37, %v95_v31  ;;  %v70_v8 = vmul.f32 %v62_v34, %v44_v51  ;;  %v193_v34 = vmul.f32 %v189_v21, %v1559_v17  ;;  %v1639_v21 = vld [vmem:[#allocation2 + $0x5f0] sm:$0xff] }
  0x93   :  { %218 = vrot.lane.b32.xlu1 %v204_v23, %s1362_s16  ;;  %v42_v23 = vld [vmem:[%s2187_s1 + $0x8] sm:$0xff] }
  0x94   :  { %216 = vrot.lane.b32.xlu0 %v203_v27, %s1362_s16  ;;  %v68_v39 = vmul.f32 %v1559_v17, %v42_v23  ;;  %v1643_v23 = vld [vmem:[#allocation2 + $0x158] sm:$0xff] }
  0x97   :  { %214 = vrot.lane.b32.xlu1 %v202_v36, %s1362_s16  ;;  %v1580_v36 = vrot.slane %v1457_v24, %v1420_v5  ;;  %v1774_v5 = vld [vmem:[#allocation2 + $0x38] sm:$0xff] }
  0x98   :  { %125 = vrot.lane.b32.xlu0 %v113_v40, %s1362_s16  ;;  %v188_v40 = vld [vmem:[%s2189_s3] sm:$0xff]  ;;  %2303 = vst [vmem:[#allocation22_spill] sm:$0xff] %v1774_v5 }
  0x9b   :  { %212 = vrot.lane.b32.xlu1 %v201_v47, %s1362_s16 }
  0x9c   :  { %123 = vrot.lane.b32.xlu0 %v112_v49, %s1362_s16 }
  0x9f   :  { %210 = vrot.lane.b32.xlu1 %v200_v52, %s1362_s16 }
  0xa0   :  { %121 = vrot.lane.b32.xlu0 %v111_v53, %s1362_s16  ;;  %v192_v53 = vmul.f32 %v188_v40, %v1580_v36  ;;  %v1656_v40 = vld [vmem:[#allocation2 + $0x5d0] sm:$0xff] }
  0xa3   :  { %174 = vrot.lane.b32.xlu1 %v160_v56, %s1362_s16  ;;  %v67_v56 = vmul.f32 %v1580_v36, %v41_v44 }
  0xa4   :  { %172 = vrot.lane.b32.xlu0 %v159_v57, %s1362_s16  ;;  %v1605_v57 = vld [vmem:[#allocation2 + $0x1d0] sm:$0xff] }
  0xa7   :  { %168 = vrot.lane.b32.xlu1 %v157_v60, %s1362_s16 }
  0xa8   :  { %170 = vrot.lane.b32.xlu0 %v158_v61, %s1362_s16 }
  0xac   :  { %166 = vrot.lane.b32.xlu0 %v156_v62, %s1362_s16 }
 0x101   :  { %v130_v63 = vpop.permute.xlu1 %129 }
 0x102   :  { %v128_v6 = vpop.permute.xlu0 %127 }
 0x103   :  { %v135_v11 = vsel %vm131_vm2, %v128_v6, %v130_v63  ;;  %v1613_v63 = vld [vmem:[#allocation2 + $0x1b0] sm:$0xff] }
 0x104   :  { %v143_v18 = vadd.f32 %v135_v11, %v70_v8  ;;  %v1622_v11 = vld [vmem:[#allocation2 + $0x190] sm:$0xff] }
 0x105   :  { %v219_v12 = vpop.permute.xlu1 %218 }
 0x106   :  { %v217_v14 = vpop.permute.xlu0 %216 }
 0x107   :  { %v223_v15 = vsel %vm131_vm2, %v217_v14, %v219_v12 }
 0x108   :  { %v1561_v19 = vadd.f32 %v223_v15, %v195_v9  ;;  %v1619_v9 = vld [vmem:[#allocation2 + $0x198] sm:$0xff]  ;;  %v146_v15 = vld [vmem:[%s2188_s2 + $0x10] sm:$0xff] }
 0x109   :  { %v215_v22 = vpop.permute.xlu1 %214 }
 0x10a   :  { %v222_v26 = vsel %vm131_vm2, %v215_v22, %v217_v14  ;;  %v126_v27 = vpop.permute.xlu0 %125  ;;  %v1572_v28 = vmul.f32 %v1561_v19, %v143_v18  ;;  %v145_v14 = vld [vmem:[%s2188_s2 + $0x8] sm:$0xff] }
 0x10b   :  { %v1574_v31 = vadd.f32 %v222_v26, %v194_v16  ;;  %v134_v32 = vsel %vm131_vm2, %v126_v27, %v128_v6  ;;  %v1645_v26 = vld [vmem:[#allocation2 + $0x5d8] sm:$0xff] }
 0x10c   :  { %v142_v37 = vadd.f32 %v134_v32, %v69_v20  ;;  %1180 = vmatprep.mubr.msk.f32.mxu1 %vm102_vm1, %v1572_v28  ;;  %v1637_v20 = vld [vmem:[#allocation2 + $0x170] sm:$0xff]  ;;  %v149_v32 = vmul.f32 %v145_v14, %v1559_v17  ;;  %v1668_v17 = vld [vmem:[#allocation2 + $0x5b8] sm:$0xff] }
 0x10d   :  { %v213_v41 = vpop.permute.xlu1 %212 }
 0x10e   :  { %v221_v47 = vsel %vm131_vm2, %v213_v41, %v215_v22  ;;  %v124_v49 = vpop.permute.xlu0 %123  ;;  %v1593_v24 = vmul.f32 %v1574_v31, %v142_v37  ;;  %v1652_v37 = vld [vmem:[#allocation2 + $0x150] sm:$0xff] }
 0x10f   :  { %v1597_v51 = vadd.f32 %v221_v47, %v193_v34  ;;  %v133_v52 = vsel %vm131_vm2, %v124_v49, %v126_v27  ;;  %v150_v34 = vmul.f32 %v146_v15, %v1546_v7  ;;  %v1670_v47 = vld [vmem:[#allocation2 + $0x130] sm:$0xff] }
 0x110   :  { %v141_v55 = vadd.f32 %v133_v52, %v68_v39  ;;  %666 = vmatmul.mubr.f32.vlgmr.msra.gmra.mxu1 %v1593_v24 }
 0x111   :  { %673 = vmatpush1.msra.mxu1 %v1595_v50  ;;  %v211_v58 = vpop.permute.xlu1 %210 }
 0x112   :  { %v220_v60 = vsel %vm131_vm2, %v211_v58, %v213_v41  ;;  %674 = vmatprep.subr.mxu1 %v1601_v54  ;;  %v122_v61 = vpop.permute.xlu0 %121  ;;  %v233_v62 = vmul.f32 %v1597_v51, %v141_v55  ;;  %v1658_v41 = vld [vmem:[#allocation2 + $0x138] sm:$0xff] }
 0x113   :  { %v1615_v6 = vadd.f32 %v220_v60, %v192_v53  ;;  %v132_v8 = vsel %vm131_vm2, %v122_v61, %v124_v49  ;;  %675 = vmatpush1.msra.mxu1 %v1605_v57  ;;  %v1679_v53 = vld [vmem:[#allocation2 + $0x118] sm:$0xff]  ;;  %v1686_v60 = vld [vmem:[#allocation2 + $0x110] sm:$0xff] }
 0x114   :  { %v140_v10 = vadd.f32 %v132_v8, %v67_v56  ;;  %676 = vmatprep.subr.mxu1 %v1608_v59  ;;  %594 = vmatprep.mubr.f32.mxu0 %v233_v62  ;;  %v1683_v58 = vld [vmem:[#allocation2 + $0x598] sm:$0xff]  ;;  %v1690_v61 = vld [vmem:[#allocation2 + $0x590] sm:$0xff] }
 0x115   :  { %677 = vmatpush1.msra.mxu1 %v1613_v63  ;;  %736 = vmatprep.mubr.f32.mxu1 %v233_v62  ;;  %v175_v12 = vpop.permute.xlu1 %174  ;;  %v1692_v62 = vld [vmem:[#allocation2 + $0xf8] sm:$0xff] }
 0x116   :  { %678 = vmatprep.subr.mxu1 %v1619_v9  ;;  %v173_v16 = vpop.permute.xlu0 %172  ;;  %v1635_v18 = vmul.f32 %v1615_v6, %v140_v10 }
 0x117   :  { %v179_v22 = vsel %vm131_vm2, %v173_v16, %v175_v12  ;;  %679 = vmatpush1.msra.mxu1 %v1622_v11  ;;  %v1699_v12 = vld [vmem:[#allocation2 + $0x578] sm:$0xff] }
 0x118   :  { %v187_v27 = vadd.f32 %v179_v22, %v1496_v43  ;;  %680 = vmatprep.subr.mxu1 %v1625_v13  ;;  %595 = vmatmul.mubr.f32.vlgmr.msra.gmra.mxu0 %v1635_v18  ;;  %v144_v43 = vld [vmem:[%s2188_s2] sm:$0xff] }
 0x119   :  { %681 = vmatpush1.msra.mxu1 %v1637_v20  ;;  %744 = vmatpush1.msra.mxu0 %v1639_v21  ;;  %v169_v39 = vpop.permute.xlu1 %168 }
 0x11a   :  { %v1664_v44 = vmul.f32 %v1561_v19, %v187_v27  ;;  %682 = vmatprep.subr.mxu1 %v1643_v23  ;;  %745 = vmatprep.subr.mxu0 %v1645_v26  ;;  %v171_v7 = vpop.permute.xlu0 %170  ;;  %v1677_v19 = vld [vmem:[#allocation2 + $0x5b0] sm:$0xff]  ;;  %v1715_v27 = vld [vmem:[#allocation2 + $0x558] sm:$0xff] }
 0x11b   :  { %1183 = vmatprep.mubr.msk.f32.mxu0 %vm102_vm1, %v1572_v28  ;;  %v177_v49 = vsel %vm131_vm2, %v169_v39, %v171_v7  ;;  %v178_v52 = vsel %vm131_vm2, %v171_v7, %v173_v16  ;;  %683 = vmatpush1.msra.mxu1 %v1652_v37  ;;  %v148_v28 = vmul.f32 %v144_v43, %v1580_v36  ;;  %v1701_v36 = vld [vmem:[#allocation2 + $0xf0] sm:$0xff]  ;;  %v1711_v16 = vld [vmem:[#allocation2 + $0xd8] sm:$0xff] }
 0x11c   :  { %v185_v55 = vadd.f32 %v177_v49, %v149_v32  ;;  %v186_v56 = vadd.f32 %v178_v52, %v150_v34  ;;  %746 = vmatpush1.msra.mxu0 %v1656_v40  ;;  %684 = vmatprep.subr.mxu1 %v1658_v41  ;;  %v1717_v32 = vld [vmem:[#allocation2 + $0xd0] sm:$0xff]  ;;  %v1723_v34 = vld [vmem:[#allocation2 + $0xb8] sm:$0xff] }
 0x11d   :  { %747 = vmatprep.subr.mxu0 %v1668_v17  ;;  %685 = vmatpush1.msra.mxu1 %v1670_v47  ;;  %v1730_v43 = vld [vmem:[#allocation2 + $0x538] sm:$0xff]  ;;  %v1732_v7 = vld [vmem:[#allocation2 + $0xb0] sm:$0xff] }
 0x11e   :  { %v1695_v8 = vmul.f32 %v1574_v31, %v186_v56  ;;  %748 = vmatpush1.msra.mxu0 %v1677_v19  ;;  %686 = vmatprep.subr.mxu1 %v1679_v53  ;;  %v167_v10 = vpop.permute.xlu0 %166  ;;  %v1704_v14 = vmul.f32 %v1597_v51, %v185_v55  ;;  %v1709_v31 = vld [vmem:[#allocation2 + $0x570] sm:$0xff]  ;;  %v1738_v52 = vld [vmem:[#allocation2 + $0x98] sm:$0xff] }
 0x11f   :  { %749 = vmatprep.subr.mxu0 %v1683_v58  ;;  %v176_v15 = vsel %vm131_vm2, %v167_v10, %v169_v39  ;;  %687 = vmatpush1.msra.mxu1 %v1686_v60  ;;  %v1721_v51 = vld [vmem:[#allocation2 + $0x550] sm:$0xff]  ;;  %v1754_v10 = vld [vmem:[#allocation2 + $0x4f8] sm:$0xff] }
 0x120   :  { %v184_v22 = vadd.f32 %v176_v15, %v148_v28  ;;  %750 = vmatpush1.msra.mxu0 %v1690_v61  ;;  %688 = vmatprep.subr.mxu1 %v1692_v62  ;;  %v1736_v49 = vld [vmem:[#allocation2 + $0x530] sm:$0xff]  ;;  %v1750_v28 = vld [vmem:[#allocation2 + $0x78] sm:$0xff]  ;;  %2296 = vst [vmem:[#allocation15_spill] sm:$0xff] %v1754_v10 }
 0x121   :  { %751 = vmatprep.subr.mxu0 %v1699_v12  ;;  %689 = vmatpush1.msra.mxu1 %v1701_v36  ;;  %v1744_v55 = vld [vmem:[#allocation2 + $0x90] sm:$0xff]  ;;  %2295 = vst [vmem:[#allocation14_spill] sm:$0xff] %v1750_v28 }
 0x122   :  { %v1726_v39 = vmul.f32 %v1615_v6, %v184_v22  ;;  %752 = vmatpush1.msra.mxu0 %v1709_v31  ;;  %690 = vmatprep.subr.mxu1 %v1711_v16  ;;  %v1742_v6 = vld [vmem:[#allocation2 + $0x518] sm:$0xff]  ;;  %v1748_v56 = vld [vmem:[#allocation2 + $0x510] sm:$0xff] }
 0x123   :  { %753 = vmatprep.subr.mxu0 %v1715_v27  ;;  %691 = vmatpush1.msra.mxu1 %v1717_v32  ;;  %2294 = vst [vmem:[#allocation13_spill] sm:$0xff] %v1748_v56  ;;  %v1756_v15 = vld [vmem:[#allocation2 + $0x70] sm:$0xff] }
 0x124   :  { %754 = vmatpush1.msra.mxu0 %v1721_v51  ;;  %692 = vmatprep.subr.mxu1 %v1723_v34  ;;  %2297 = vst [vmem:[#allocation16_spill] sm:$0xff] %v1756_v15  ;;  %v1760_v22 = vld [vmem:[#allocation2 + $0x4f0] sm:$0xff] }
 0x125   :  { %755 = vmatprep.subr.mxu0 %v1730_v43  ;;  %693 = vmatpush1.msra.mxu1 %v1732_v7  ;;  %2298 = vst [vmem:[#allocation17_spill] sm:$0xff] %v1760_v22 }
 0x126   :  { %756 = vmatpush1.msra.mxu0 %v1736_v49  ;;  %694 = vmatprep.subr.mxu1 %v1738_v52 }
 0x127   :  { %757 = vmatprep.subr.mxu0 %v1742_v6  ;;  %695 = vmatpush1.msra.mxu1 %v1744_v55 }
 0x128   :  { %758 = vmatpush1.msra.mxu0 %v1748_v56  ;;  %696 = vmatprep.subr.mxu1 %v1750_v28  ;;  %v1780_v56 = vld [vmem:[#allocation2 + $0x30] sm:$0xff] }
 0x129   :  { %759 = vmatprep.subr.mxu0 %v1754_v10  ;;  %697 = vmatpush1.msra.mxu1 %v1756_v15  ;;  %2305 = vst [vmem:[#allocation24_spill] sm:$0xff] %v1780_v56  ;;  %v1784_v28 = vld [vmem:[#allocation2 + $0x4b0] sm:$0xff]  ;;  %v1786_v10 = vld [vmem:[#allocation2 + $0x18] sm:$0xff] }
 0x12a   :  { %760 = vmatpush1.msra.mxu0 %v1760_v22  ;;  %698 = vmatprep.subr.mxu1 %v1762_v0  ;;  %2306 = vst [vmem:[#allocation25_spill] sm:$0xff] %v1784_v28  ;;  %2307 = vst [vmem:[#allocation26_spill] sm:$0xff] %v1786_v10  ;;  %v1790_v15 = vld [vmem:[#allocation2 + $0x498] sm:$0xff]  ;;  %v1792_v22 = vld [vmem:[#allocation2 + $0x10] sm:$0xff] }
 0x12b   :  { %761 = vmatprep.subr.mxu0 %v1766_v1  ;;  %699 = vmatpush1.msra.mxu1 %v1768_v4  ;;  %2308 = vst [vmem:[#allocation27_spill] sm:$0xff] %v1790_v15  ;;  %2309 = vst [vmem:[#allocation28_spill] sm:$0xff] %v1792_v22  ;;  %v1796_v0 = vld [vmem:[#allocation2 + $0x490] sm:$0xff]  ;;  %v1798_v1 = vld [vmem:[#allocation2 + $0x3f8] sm:$0xff] }
 0x12c   :  { %762 = vmatpush1.msra.mxu0 %v1772_v2  ;;  %700 = vmatprep.subr.mxu1 %v1774_v5  ;;  %2310 = vst [vmem:[#allocation29_spill] sm:$0xff] %v1796_v0  ;;  %2311 = vst [vmem:[#allocation30_spill] sm:$0xff] %v1798_v1  ;;  %v1802_v4 = vld [vmem:[#allocation2 + $0x478] sm:$0xff]  ;;  %v1804_v2 = vld [vmem:[#allocation2 + $0x3f0] sm:$0xff] }
 0x12d   :  { %763 = vmatprep.subr.mxu0 %v1778_v3  ;;  %701 = vmatpush1.msra.mxu1 %v1780_v56  ;;  %2312 = vst [vmem:[#allocation31_spill] sm:$0xff] %v1802_v4  ;;  %2313 = vst [vmem:[#allocation32_spill] sm:$0xff] %v1804_v2  ;;  %v1808_v5 = vld [vmem:[#allocation2 + $0x470] sm:$0xff]  ;;  %v1810_v3 = vld [vmem:[#allocation2 + $0x3d8] sm:$0xff] }
 0x12e   :  { %764 = vmatpush1.msra.mxu0 %v1784_v28  ;;  %702 = vmatprep.subr.mxu1 %v1786_v10  ;;  %2314 = vst [vmem:[#allocation33_spill] sm:$0xff] %v1808_v5  ;;  %2315 = vst [vmem:[#allocation34_spill] sm:$0xff] %v1810_v3  ;;  %v1814_v56 = vld [vmem:[#allocation2 + $0x458] sm:$0xff]  ;;  %v1816_v28 = vld [vmem:[#allocation2 + $0x3d0] sm:$0xff] }
 0x12f   :  { %765 = vmatprep.subr.mxu0 %v1790_v15  ;;  %703 = vmatpush1.msra.mxu1 %v1792_v22  ;;  %2316 = vst [vmem:[#allocation35_spill] sm:$0xff] %v1814_v56  ;;  %2317 = vst [vmem:[#allocation36_spill] sm:$0xff] %v1816_v28  ;;  %v1820_v10 = vld [vmem:[#allocation2 + $0x450] sm:$0xff]  ;;  %v1822_v15 = vld [vmem:[#allocation2 + $0x3b8] sm:$0xff] }
 0x130   :  { %766 = vmatpush1.msra.mxu0 %v1796_v0  ;;  %704 = vmatprep.subr.mxu1 %v1798_v1  ;;  %2318 = vst [vmem:[#allocation37_spill] sm:$0xff] %v1820_v10  ;;  %2319 = vst [vmem:[#allocation38_spill] sm:$0xff] %v1822_v15  ;;  %v1826_v22 = vld [vmem:[#allocation2 + $0x438] sm:$0xff]  ;;  %v1828_v0 = vld [vmem:[#allocation2 + $0x3b0] sm:$0xff] }
 0x131   :  { %767 = vmatprep.subr.mxu0 %v1802_v4  ;;  %705 = vmatpush2.msra.mxu1 %v1804_v2  ;;  %2320 = vst [vmem:[#allocation39_spill] sm:$0xff] %v1826_v22  ;;  %2321 = vst [vmem:[#allocation40_spill] sm:$0xff] %v1828_v0  ;;  %v1832_v1 = vld [vmem:[#allocation2 + $0x430] sm:$0xff]  ;;  %v1834_v4 = vld [vmem:[#allocation2 + $0x398] sm:$0xff] }
 0x132   :  { %768 = vmatpush1.msra.mxu0 %v1808_v5  ;;  %706 = vmatprep.subr.mxu1 %v1810_v3  ;;  %2322 = vst [vmem:[#allocation41_spill] sm:$0xff] %v1832_v1  ;;  %2323 = vst [vmem:[#allocation42_spill] sm:$0xff] %v1834_v4  ;;  %v1838_v2 = vld [vmem:[#allocation2 + $0x418] sm:$0xff]  ;;  %v1840_v5 = vld [vmem:[#allocation2 + $0x390] sm:$0xff] }
 0x133   :  { %769 = vmatprep.subr.mxu0 %v1814_v56  ;;  %707 = vmatpush2.msra.mxu1 %v1816_v28  ;;  %2324 = vst [vmem:[#allocation43_spill] sm:$0xff] %v1838_v2  ;;  %2325 = vst [vmem:[#allocation44_spill] sm:$0xff] %v1840_v5  ;;  %v1844_v3 = vld [vmem:[#allocation2 + $0x410] sm:$0xff]  ;;  %v1846_v56 = vld [vmem:[#allocation2 + $0x378] sm:$0xff] }
 0x134   :  { %770 = vmatpush1.msra.mxu0 %v1820_v10  ;;  %708 = vmatprep.subr.mxu1 %v1822_v15  ;;  %2326 = vst [vmem:[#allocation45_spill] sm:$0xff] %v1844_v3  ;;  %2327 = vst [vmem:[#allocation46_spill] sm:$0xff] %v1846_v56  ;;  %v1850_v28 = vld [vmem:[#allocation2 + $0x7d8] sm:$0xf]  ;;  %v1852_v10 = vld [vmem:[#allocation2 + $0x370] sm:$0xff] }
 0x135   :  { %771 = vmatprep.subr.mxu0 %v1826_v22  ;;  %709 = vmatpush2.msra.mxu1 %v1828_v0  ;;  %2328 = vst [vmem:[#allocation47_spill] sm:$0xff] %v1850_v28  ;;  %2329 = vst [vmem:[#allocation48_spill] sm:$0xff] %v1852_v10  ;;  %v1856_v15 = vld [vmem:[#allocation2 + $0x7d0] sm:$0xf]  ;;  %v1858_v22 = vld [vmem:[#allocation2 + $0x358] sm:$0xff] }
 0x136   :  { %772 = vmatpush1.msra.mxu0 %v1832_v1  ;;  %710 = vmatprep.subr.mxu1 %v1834_v4  ;;  %2330 = vst [vmem:[#allocation49_spill] sm:$0xff] %v1856_v15  ;;  %2331 = vst [vmem:[#allocation50_spill] sm:$0xff] %v1858_v22  ;;  %v1862_v0 = vld [vmem:[#allocation2 + $0x7b8] sm:$0xff]  ;;  %v1864_v1 = vld [vmem:[#allocation2 + $0x350] sm:$0xff] }
 0x137   :  { %773 = vmatprep.subr.mxu0 %v1838_v2  ;;  %711 = vmatpush2.msra.mxu1 %v1840_v5  ;;  %2332 = vst [vmem:[#allocation51_spill] sm:$0xff] %v1862_v0  ;;  %2333 = vst [vmem:[#allocation52_spill] sm:$0xff] %v1864_v1  ;;  %v1869_v2 = vld [vmem:[#allocation2 + $0x7b0] sm:$0xff]  ;;  %v1871_v5 = vld [vmem:[#allocation2 + $0x338] sm:$0xff] }
 0x138   :  { %774 = vmatpush1.msra.mxu0 %v1844_v3  ;;  %712 = vmatprep.subr.mxu1 %v1846_v56  ;;  %2334 = vst [vmem:[#allocation53_spill] sm:$0xff] %v1869_v2  ;;  %2335 = vst [vmem:[#allocation54_spill] sm:$0xff] %v1871_v5  ;;  %v1876_v3 = vld [vmem:[#allocation2 + $0x798] sm:$0xff]  ;;  %v1878_v56 = vld [vmem:[#allocation2 + $0x330] sm:$0xff] }
 0x139   :  { %1181 = vmatprep.subr.msk.mxu0 %vm517_vm0, %v1850_v28  ;;  %713 = vmatpush2.msra.mxu1 %v1852_v10  ;;  %2336 = vst [vmem:[#allocation55_spill] sm:$0xff] %v1876_v3  ;;  %2337 = vst [vmem:[#allocation56_spill] sm:$0xff] %v1878_v56  ;;  %v1882_v28 = vld [vmem:[#allocation2 + $0x790] sm:$0xff]  ;;  %v1884_v10 = vld [vmem:[#allocation2 + $0x318] sm:$0xff] }
 0x13a   :  { %1182 = vmatpush2.msk.msra.mxu0 %vm517_vm0, %v1856_v15  ;;  %714 = vmatprep.subr.mxu1 %v1858_v22  ;;  %2338 = vst [vmem:[#allocation57_spill] sm:$0xff] %v1882_v28  ;;  %2339 = vst [vmem:[#allocation58_spill] sm:$0xff] %v1884_v10  ;;  %v1888_v4 = vld [vmem:[#allocation2 + $0x778] sm:$0xff]  ;;  %v1890_v15 = vld [vmem:[#allocation2 + $0x310] sm:$0xff] }
 0x13b   :  { %779 = vmatprep.subr.mxu0 %v1862_v0  ;;  %715 = vmatpush2.msra.mxu1 %v1864_v1  ;;  %2340 = vst [vmem:[#allocation59_spill] sm:$0xff] %v1888_v4  ;;  %2341 = vst [vmem:[#allocation60_spill] sm:$0xff] %v1890_v15  ;;  %v1894_v22 = vld [vmem:[#allocation2 + $0x770] sm:$0xff]  ;;  %v1896_v0 = vld [vmem:[#allocation2 + $0x2f8] sm:$0xff] }
 0x13c   :  { %780 = vmatpush2.msra.mxu0 %v1869_v2  ;;  %716 = vmatprep.subr.mxu1 %v1871_v5  ;;  %2342 = vst [vmem:[#allocation61_spill] sm:$0xff] %v1894_v22  ;;  %2343 = vst [vmem:[#allocation62_spill] sm:$0xff] %v1896_v0  ;;  %v1900_v1 = vld [vmem:[#allocation2 + $0x758] sm:$0xff]  ;;  %v1902_v2 = vld [vmem:[#allocation2 + $0x2f0] sm:$0xff] }
 0x13d   :  { %781 = vmatprep.subr.mxu0 %v1876_v3  ;;  %717 = vmatpush2.msra.mxu1 %v1878_v56  ;;  %2344 = vst [vmem:[#allocation63_spill] sm:$0xff] %v1900_v1  ;;  %2345 = vst [vmem:[#allocation64_spill] sm:$0xff] %v1902_v2  ;;  %v1906_v5 = vld [vmem:[#allocation2 + $0x750] sm:$0xff]  ;;  %v1908_v3 = vld [vmem:[#allocation2 + $0x2d8] sm:$0xff] }
 0x13e   :  { %782 = vmatpush2.msra.mxu0 %v1882_v28  ;;  %718 = vmatprep.subr.mxu1 %v1884_v10  ;;  %2346 = vst [vmem:[#allocation65_spill] sm:$0xff] %v1906_v5  ;;  %2347 = vst [vmem:[#allocation66_spill] sm:$0xff] %v1908_v3  ;;  %v1912_v56 = vld [vmem:[#allocation2 + $0x738] sm:$0xff]  ;;  %v1914_v28 = vld [vmem:[#allocation2 + $0x2d0] sm:$0xff] }
 0x13f   :  { %783 = vmatprep.subr.mxu0 %v1888_v4  ;;  %719 = vmatpush2.msra.mxu1 %v1890_v15  ;;  %2348 = vst [vmem:[#allocation67_spill] sm:$0xff] %v1912_v56  ;;  %2349 = vst [vmem:[#allocation68_spill] sm:$0xff] %v1914_v28  ;;  %v1918_v10 = vld [vmem:[#allocation2 + $0x730] sm:$0xff]  ;;  %v1920_v4 = vld [vmem:[#allocation2 + $0x2b8] sm:$0xff] }
 0x140   :  { %784 = vmatpush2.msra.mxu0 %v1894_v22  ;;  %720 = vmatprep.subr.mxu1 %v1896_v0  ;;  %2350 = vst [vmem:[#allocation69_spill] sm:$0xff] %v1918_v10  ;;  %2351 = vst [vmem:[#allocation70_spill] sm:$0xff] %v1920_v4  ;;  %v1924_v15 = vld [vmem:[#allocation2 + $0x718] sm:$0xff]  ;;  %v1926_v22 = vld [vmem:[#allocation2 + $0x2b0] sm:$0xff] }
 0x141   :  { %785 = vmatprep.subr.mxu0 %v1900_v1  ;;  %721 = vmatpush2.msra.mxu1 %v1902_v2  ;;  %2352 = vst [vmem:[#allocation71_spill] sm:$0xff] %v1924_v15  ;;  %2353 = vst [vmem:[#allocation72_spill] sm:$0xff] %v1926_v22  ;;  %v1930_v0 = vld [vmem:[#allocation2 + $0x710] sm:$0xff]  ;;  %v1932_v1 = vld [vmem:[#allocation2 + $0x298] sm:$0xff] }
 0x142   :  { %786 = vmatpush2.msra.mxu0 %v1906_v5  ;;  %722 = vmatprep.subr.mxu1 %v1908_v3  ;;  %2354 = vst [vmem:[#allocation73_spill] sm:$0xff] %v1930_v0  ;;  %2355 = vst [vmem:[#allocation74_spill] sm:$0xff] %v1932_v1  ;;  %v1936_v2 = vld [vmem:[#allocation2 + $0x6f8] sm:$0xff]  ;;  %v1938_v5 = vld [vmem:[#allocation2 + $0x290] sm:$0xff] }
 0x143   :  { %787 = vmatprep.subr.mxu0 %v1912_v56  ;;  %723 = vmatpush2.msra.mxu1 %v1914_v28  ;;  %2356 = vst [vmem:[#allocation75_spill] sm:$0xff] %v1936_v2  ;;  %2357 = vst [vmem:[#allocation76_spill] sm:$0xff] %v1938_v5  ;;  %v1942_v3 = vld [vmem:[#allocation2 + $0x6f0] sm:$0xff]  ;;  %v1944_v56 = vld [vmem:[#allocation2 + $0x278] sm:$0xff] }
 0x144   :  { %788 = vmatpush2.msra.mxu0 %v1918_v10  ;;  %724 = vmatprep.subr.mxu1 %v1920_v4  ;;  %2358 = vst [vmem:[#allocation77_spill] sm:$0xff] %v1942_v3  ;;  %2359 = vst [vmem:[#allocation78_spill] sm:$0xff] %v1944_v56  ;;  %v1948_v28 = vld [vmem:[#allocation2 + $0x6d8] sm:$0xff]  ;;  %v1950_v10 = vld [vmem:[#allocation2 + $0x270] sm:$0xff] }
 0x145   :  { %789 = vmatprep.subr.mxu0 %v1924_v15  ;;  %725 = vmatpush2.msra.mxu1 %v1926_v22  ;;  %2360 = vst [vmem:[#allocation79_spill] sm:$0xff] %v1948_v28  ;;  %2361 = vst [vmem:[#allocation80_spill] sm:$0xff] %v1950_v10  ;;  %v1954_v4 = vld [vmem:[#allocation2 + $0x6d0] sm:$0xff]  ;;  %v1956_v15 = vld [vmem:[#allocation2 + $0x258] sm:$0xff] }
 0x146   :  { %790 = vmatpush2.msra.mxu0 %v1930_v0  ;;  %726 = vmatprep.subr.mxu1 %v1932_v1  ;;  %2362 = vst [vmem:[#allocation81_spill] sm:$0xff] %v1954_v4  ;;  %2363 = vst [vmem:[#allocation82_spill] sm:$0xff] %v1956_v15  ;;  %v1960_v22 = vld [vmem:[#allocation2 + $0x6b8] sm:$0xff]  ;;  %v1962_v0 = vld [vmem:[#allocation2 + $0x250] sm:$0xff] }
 0x147   :  { %791 = vmatprep.subr.mxu0 %v1936_v2  ;;  %727 = vmatpush2.msra.mxu1 %v1938_v5  ;;  %2364 = vst [vmem:[#allocation83_spill] sm:$0xff] %v1962_v0  ;;  %v1966_v1 = vld [vmem:[#allocation2 + $0x6b0] sm:$0xff]  ;;  %v1968_v2 = vld [vmem:[#allocation2 + $0x238] sm:$0xff] }
 0x148   :  { %792 = vmatpush2.msra.mxu0 %v1942_v3  ;;  %728 = vmatprep.subr.mxu1 %v1944_v56  ;;  %2365 = vst [vmem:[#allocation84_spill] sm:$0xff] %v1968_v2  ;;  %v1972_v5 = vld [vmem:[#allocation2 + $0x698] sm:$0xff]  ;;  %v1974_v3 = vld [vmem:[#allocation2 + $0x230] sm:$0xff] }
 0x149   :  { %793 = vmatprep.subr.mxu0 %v1948_v28  ;;  %729 = vmatpush2.msra.mxu1 %v1950_v10  ;;  %2366 = vst [vmem:[#allocation85_spill] sm:$0xff] %v1972_v5  ;;  %2367 = vst [vmem:[#allocation86_spill] sm:$0xff] %v1974_v3  ;;  %v1978_v56 = vld [vmem:[#allocation2 + $0x690] sm:$0xff]  ;;  %v1980_v28 = vld [vmem:[#allocation2 + $0x218] sm:$0xff] }
 0x14a   :  { %794 = vmatpush2.msra.mxu0 %v1954_v4  ;;  %730 = vmatprep.subr.mxu1 %v1956_v15  ;;  %2368 = vst [vmem:[#allocation87_spill] sm:$0xff] %v1978_v56  ;;  %2369 = vst [vmem:[#allocation88_spill] sm:$0xff] %v1980_v28  ;;  %v1984_v10 = vld [vmem:[#allocation2 + $0x678] sm:$0xff]  ;;  %v1986_v4 = vld [vmem:[#allocation2 + $0x210] sm:$0xff] }
 0x14b   :  { %795 = vmatprep.subr.mxu0 %v1960_v22  ;;  %731 = vmatpush2.msra.mxu1 %v1962_v0  ;;  %2370 = vst [vmem:[#allocation89_spill] sm:$0xff] %v1984_v10  ;;  %2371 = vst [vmem:[#allocation90_spill] sm:$0xff] %v1986_v4  ;;  %v1990_v15 = vld [vmem:[#allocation2 + $0x670] sm:$0xff]  ;;  %v1994_v0 = vld [vmem:[#allocation2 + $0x658] sm:$0xff] }
 0x14c   :  { %796 = vmatpush2.msra.mxu0 %v1966_v1  ;;  %732 = vmatprep.subr.mxu1 %v1968_v2  ;;  %2372 = vst [vmem:[#allocation91_spill] sm:$0xff] %v1990_v15  ;;  %2373 = vst [vmem:[#allocation92_spill] sm:$0xff] %v1994_v0  ;;  %v1998_v2 = vld [vmem:[#allocation2 + $0x650] sm:$0xff] }
 0x14d   :  { %797 = vmatprep.subr.mxu0 %v1972_v5  ;;  %733 = vmatpush2.msra.mxu1 %v1974_v3  ;;  %2374 = vst [vmem:[#allocation93_spill] sm:$0xff] %v1998_v2  ;;  %v2002_v5 = vld [vmem:[#allocation2 + $0x638] sm:$0xff]  ;;  %v1196_v3 = vld [vmem:[#allocation2 + $0x5e8] sm:$0xff] }
 0x14e   :  { %798 = vmatpush2.msra.mxu0 %v1978_v56  ;;  %734 = vmatprep.subr.mxu1 %v1980_v28  ;;  %2375 = vst [vmem:[#allocation94_spill] sm:$0xff] %v2002_v5  ;;  %v2005_v56 = vld [vmem:[#allocation2 + $0x630] sm:$0xff]  ;;  %v1197_v28 = vld [vmem:[#allocation2 + $0x5e0] sm:$0xff] }
 0x14f   :  { %799 = vmatprep.subr.mxu0 %v1984_v10  ;;  %735 = vmatpush2.msra.mxu1 %v1986_v4  ;;  %2376 = vst [vmem:[#allocation95_spill] sm:$0xff] %v2005_v56  ;;  %v2008_v10 = vld [vmem:[#allocation2 + $0x618] sm:$0xff]  ;;  %v1204_v4 = vld [vmem:[#allocation2 + $0x1e0] sm:$0xff] }
 0x150   :  { %800 = vmatpush2.msra.mxu0 %v1990_v15  ;;  %737 = vmatmul.mubr.f32.vlgmr.msra.gmra.mxu1 %v1635_v18  ;;  %2377 = vst [vmem:[#allocation96_spill] sm:$0xff] %v2008_v10  ;;  %v2013_v18 = vld [vmem:[#allocation2 + $0x610] sm:$0xff]  ;;  %v1198_v15 = vld [vmem:[#allocation2 + $0x5c8] sm:$0xff] }
 0x151   :  { %801 = vmatprep.subr.mxu0 %v1994_v0  ;;  %892 = vmatprep.subr.mxu1 %v1196_v3  ;;  %2378 = vst [vmem:[#allocation97_spill] sm:$0xff] %v2013_v18  ;;  %v1199_v3 = vld [vmem:[#allocation2 + $0x5c0] sm:$0xff]  ;;  %v1202_v0 = vld [vmem:[#allocation2 + $0x1e8] sm:$0xff] }
 0x152   :  { %802 = vmatpush2.msra.mxu0 %v1998_v2  ;;  %893 = vmatpush1.msra.mxu1 %v1197_v28  ;;  %v1200_v2 = vld [vmem:[#allocation2 + $0x5a8] sm:$0xff]  ;;  %v1201_v28 = vld [vmem:[#allocation2 + $0x5a0] sm:$0xff] }
 0x153   :  { %1186 = vmatprep.mubr.msk.f32.mxu1 %vm102_vm1, %v1664_v44  ;;  %803 = vmatprep.subr.mxu0 %v2002_v5  ;;  %v1203_v5 = vld [vmem:[#allocation2 + $0x588] sm:$0xff] }
 0x154   :  { %894 = vmatprep.subr.mxu1 %v1198_v15  ;;  %804 = vmatpush2.msra.mxu0 %v2005_v56  ;;  %v1205_v15 = vld [vmem:[#allocation2 + $0x580] sm:$0xff]  ;;  %v1215_v56 = vld [vmem:[#allocation2 + $0x528] sm:$0xff] }
 0x155   :  { %895 = vmatpush1.msra.mxu1 %v1199_v3  ;;  %805 = vmatprep.subr.mxu0 %v2008_v10  ;;  %v1206_v3 = vld [vmem:[#allocation2 + $0x1c8] sm:$0xff] }
 0x156   :  { %896 = vmatprep.subr.mxu1 %v1200_v2  ;;  %806 = vmatpush2.msra.mxu0 %v2013_v18  ;;  %v1207_v10 = vld [vmem:[#allocation2 + $0x568] sm:$0xff]  ;;  %v1208_v2 = vld [vmem:[#allocation2 + $0x1c0] sm:$0xff] }
 0x157   :  { %897 = vmatpush1.msra.mxu1 %v1201_v28  ;;  %808 = vmatmul.mubr.f32.vlgmr.msra.gmra.mxu0 %v1593_v24  ;;  %v1209_v18 = vld [vmem:[#allocation2 + $0x560] sm:$0xff]  ;;  %v1210_v28 = vld [vmem:[#allocation2 + $0x1a8] sm:$0xff] }
 0x158   :  { %821 = vmatprep.subr.mxu0 %v1202_v0  ;;  %898 = vmatprep.subr.mxu1 %v1203_v5  ;;  %v1211_v24 = vld [vmem:[#allocation2 + $0x548] sm:$0xff]  ;;  %v1212_v0 = vld [vmem:[#allocation2 + $0x1a0] sm:$0xff] }
 0x159   :  { %822 = vmatpush1.msra.mxu0 %v1204_v4  ;;  %885 = vmatprep.mubr.f32.mxu0 %v1704_v14  ;;  %v1213_v5 = vld [vmem:[#allocation2 + $0x540] sm:$0xff]  ;;  %v1214_v4 = vld [vmem:[#allocation2 + $0x188] sm:$0xff] }
 0x15a   :  { %899 = vmatpush1.msra.mxu1 %v1205_v15  ;;  %823 = vmatprep.subr.mxu0 %v1206_v3  ;;  %v1216_v15 = vld [vmem:[#allocation2 + $0x180] sm:$0xff] }
 0x15b   :  { %900 = vmatprep.subr.mxu1 %v1207_v10  ;;  %824 = vmatpush1.msra.mxu0 %v1208_v2  ;;  %v1217_v3 = vld [vmem:[#allocation2 + $0x520] sm:$0xff]  ;;  %v1218_v10 = vld [vmem:[#allocation2 + $0x168] sm:$0xff] }
 0x15c   :  { %901 = vmatpush1.msra.mxu1 %v1209_v18  ;;  %825 = vmatprep.subr.mxu0 %v1210_v28  ;;  %v1219_v2 = vld [vmem:[#allocation2 + $0x508] sm:$0xff]  ;;  %v1220_v18 = vld [vmem:[#allocation2 + $0x160] sm:$0xff] }
 0x15d   :  { %902 = vmatprep.subr.mxu1 %v1211_v24  ;;  %826 = vmatpush1.msra.mxu0 %v1212_v0  ;;  %v1221_v28 = vld [vmem:[#allocation2 + $0x500] sm:$0xff]  ;;  %v1222_v24 = vld [vmem:[#allocation2 + $0x148] sm:$0xff] }
 0x15e   :  { %903 = vmatpush1.msra.mxu1 %v1213_v5  ;;  %827 = vmatprep.subr.mxu0 %v1214_v4  ;;  %v1223_v0 = vld [vmem:[#allocation2 + $0x4e8] sm:$0xff]  ;;  %v1224_v5 = vld [vmem:[#allocation2 + $0x140] sm:$0xff] }
 0x15f   :  { %904 = vmatprep.subr.mxu1 %v1215_v56  ;;  %828 = vmatpush1.msra.mxu0 %v1216_v15  ;;  %v1225_v4 = vld [vmem:[#allocation2 + $0x4e0] sm:$0xff]  ;;  %v1226_v56 = vld [vmem:[#allocation2 + $0x128] sm:$0xff] }
 0x160   :  { %905 = vmatpush1.msra.mxu1 %v1217_v3  ;;  %829 = vmatprep.subr.mxu0 %v1218_v10  ;;  %v1227_v15 = vld [vmem:[#allocation2 + $0x4c8] sm:$0xff]  ;;  %v1228_v3 = vld [vmem:[#allocation2 + $0x120] sm:$0xff] }
 0x161   :  { %906 = vmatprep.subr.mxu1 %v1219_v2  ;;  %830 = vmatpush1.msra.mxu0 %v1220_v18  ;;  %v1229_v10 = vld [vmem:[#allocation2 + $0x4c0] sm:$0xff]  ;;  %v1230_v2 = vld [vmem:[#allocation2 + $0x108] sm:$0xff] }
 0x162   :  { %907 = vmatpush1.msra.mxu1 %v1221_v28  ;;  %831 = vmatprep.subr.mxu0 %v1222_v24  ;;  %v1231_v18 = vld [vmem:[#allocation2 + $0x4a8] sm:$0xff]  ;;  %v1232_v28 = vld [vmem:[#allocation2 + $0x100] sm:$0xff] }
 0x163   :  { %908 = vmatprep.subr.mxu1 %v1223_v0  ;;  %832 = vmatpush1.msra.mxu0 %v1224_v5  ;;  %v1233_v24 = vld [vmem:[#allocation2 + $0x4a0] sm:$0xff]  ;;  %v1234_v0 = vld [vmem:[#allocation2 + $0xe8] sm:$0xff] }
 0x164   :  { %909 = vmatpush1.msra.mxu1 %v1225_v4  ;;  %833 = vmatprep.subr.mxu0 %v1226_v56  ;;  %v1235_v5 = vld [vmem:[#allocation2 + $0x488] sm:$0xff]  ;;  %v1236_v4 = vld [vmem:[#allocation2 + $0xe0] sm:$0xff] }
 0x165   :  { %910 = vmatprep.subr.mxu1 %v1227_v15  ;;  %834 = vmatpush1.msra.mxu0 %v1228_v3  ;;  %v1237_v56 = vld [vmem:[#allocation2 + $0x480] sm:$0xff]  ;;  %v1238_v15 = vld [vmem:[#allocation2 + $0xc8] sm:$0xff] }
 0x166   :  { %911 = vmatpush1.msra.mxu1 %v1229_v10  ;;  %835 = vmatprep.subr.mxu0 %v1230_v2  ;;  %v1239_v3 = vld [vmem:[#allocation2 + $0x468] sm:$0xff]  ;;  %v1240_v10 = vld [vmem:[#allocation2 + $0xc0] sm:$0xff] }
 0x167   :  { %912 = vmatprep.subr.mxu1 %v1231_v18  ;;  %836 = vmatpush1.msra.mxu0 %v1232_v28  ;;  %v1241_v2 = vld [vmem:[#allocation2 + $0x460] sm:$0xff]  ;;  %v1242_v18 = vld [vmem:[#allocation2 + $0xa8] sm:$0xff] }
 0x168   :  { %913 = vmatpush1.msra.mxu1 %v1233_v24  ;;  %837 = vmatprep.subr.mxu0 %v1234_v0  ;;  %v1243_v28 = vld [vmem:[#allocation2 + $0x448] sm:$0xff]  ;;  %v1244_v24 = vld [vmem:[#allocation2 + $0xa0] sm:$0xff] }
 0x169   :  { %914 = vmatprep.subr.mxu1 %v1235_v5  ;;  %838 = vmatpush1.msra.mxu0 %v1236_v4  ;;  %v1245_v0 = vld [vmem:[#allocation2 + $0x440] sm:$0xff]  ;;  %v1246_v5 = vld [vmem:[#allocation2 + $0x88] sm:$0xff] }
 0x16a   :  { %915 = vmatpush1.msra.mxu1 %v1237_v56  ;;  %839 = vmatprep.subr.mxu0 %v1238_v15  ;;  %v1247_v4 = vld [vmem:[#allocation2 + $0x428] sm:$0xff]  ;;  %v1248_v56 = vld [vmem:[#allocation2 + $0x80] sm:$0xff] }
 0x16b   :  { %916 = vmatprep.subr.mxu1 %v1239_v3  ;;  %840 = vmatpush1.msra.mxu0 %v1240_v10  ;;  %v1249_v15 = vld [vmem:[#allocation2 + $0x420] sm:$0xff]  ;;  %v1250_v3 = vld [vmem:[#allocation2 + $0x68] sm:$0xff] }
 0x16c   :  { %917 = vmatpush1.msra.mxu1 %v1241_v2  ;;  %841 = vmatprep.subr.mxu0 %v1242_v18  ;;  %v1251_v10 = vld [vmem:[#allocation2 + $0x408] sm:$0xff]  ;;  %v1252_v2 = vld [vmem:[#allocation2 + $0x60] sm:$0xff] }
 0x16d   :  { %918 = vmatprep.subr.mxu1 %v1243_v28  ;;  %842 = vmatpush1.msra.mxu0 %v1244_v24  ;;  %v1253_v18 = vld [vmem:[#allocation2 + $0x400] sm:$0xff]  ;;  %v1254_v28 = vld [vmem:[#allocation2 + $0x48] sm:$0xff] }
 0x16e   :  { %919 = vmatpush1.msra.mxu1 %v1245_v0  ;;  %843 = vmatprep.subr.mxu0 %v1246_v5  ;;  %v1255_v24 = vld [vmem:[#allocation2 + $0x7c8] sm:$0xf]  ;;  %v1256_v0 = vld [vmem:[#allocation2 + $0x40] sm:$0xff] }
 0x16f   :  { %920 = vmatprep.subr.mxu1 %v1247_v4  ;;  %844 = vmatpush1.msra.mxu0 %v1248_v56  ;;  %v1257_v5 = vld [vmem:[#allocation2 + $0x7c0] sm:$0xf]  ;;  %v1258_v4 = vld [vmem:[#allocation2 + $0x28] sm:$0xff] }
 0x170   :  { %921 = vmatpush1.msra.mxu1 %v1249_v15  ;;  %845 = vmatprep.subr.mxu0 %v1250_v3  ;;  %v1259_v56 = vld [vmem:[#allocation2 + $0x7a8] sm:$0xff]  ;;  %v1260_v15 = vld [vmem:[#allocation2 + $0x20] sm:$0xff] }
 0x171   :  { %922 = vmatprep.subr.mxu1 %v1251_v10  ;;  %846 = vmatpush1.msra.mxu0 %v1252_v2  ;;  %v1261_v3 = vld [vmem:[#allocation2 + $0x7a0] sm:$0xff]  ;;  %v1262_v10 = vld [vmem:[#allocation2 + $0x8] sm:$0xff] }
 0x172   :  { %923 = vmatpush1.msra.mxu1 %v1253_v18  ;;  %847 = vmatprep.subr.mxu0 %v1254_v28  ;;  %v1263_v2 = vld [vmem:[#allocation2 + $0x788] sm:$0xff]  ;;  %v1264_v18 = vld [vmem:[#allocation2] sm:$0xff] }
 0x173   :  { %1184 = vmatprep.subr.msk.mxu1 %vm517_vm0, %v1255_v24  ;;  %848 = vmatpush1.msra.mxu0 %v1256_v0  ;;  %v1265_v28 = vld [vmem:[#allocation2 + $0x780] sm:$0xff]  ;;  %v1266_v24 = vld [vmem:[#allocation2 + $0x3e8] sm:$0xff] }
 0x174   :  { %1185 = vmatpush2.msk.msra.mxu1 %vm517_vm0, %v1257_v5  ;;  %849 = vmatprep.subr.mxu0 %v1258_v4  ;;  %v1267_v0 = vld [vmem:[#allocation2 + $0x768] sm:$0xff]  ;;  %v1268_v5 = vld [vmem:[#allocation2 + $0x3e0] sm:$0xff] }
 0x175   :  { %928 = vmatprep.subr.mxu1 %v1259_v56  ;;  %850 = vmatpush1.msra.mxu0 %v1260_v15  ;;  %v1269_v4 = vld [vmem:[#allocation2 + $0x760] sm:$0xff]  ;;  %v1270_v56 = vld [vmem:[#allocation2 + $0x3c8] sm:$0xff] }
 0x176   :  { %929 = vmatpush2.msra.mxu1 %v1261_v3  ;;  %851 = vmatprep.subr.mxu0 %v1262_v10  ;;  %v1271_v15 = vld [vmem:[#allocation2 + $0x748] sm:$0xff]  ;;  %v1272_v3 = vld [vmem:[#allocation2 + $0x3c0] sm:$0xff] }
 0x177   :  { %930 = vmatprep.subr.mxu1 %v1263_v2  ;;  %852 = vmatpush1.msra.mxu0 %v1264_v18  ;;  %v1273_v10 = vld [vmem:[#allocation2 + $0x740] sm:$0xff]  ;;  %v1274_v2 = vld [vmem:[#allocation2 + $0x3a8] sm:$0xff] }
 0x178   :  { %931 = vmatpush2.msra.mxu1 %v1265_v28  ;;  %853 = vmatprep.subr.mxu0 %v1266_v24  ;;  %v1275_v18 = vld [vmem:[#allocation2 + $0x728] sm:$0xff]  ;;  %v1276_v28 = vld [vmem:[#allocation2 + $0x3a0] sm:$0xff] }
 0x179   :  { %932 = vmatprep.subr.mxu1 %v1267_v0  ;;  %854 = vmatpush2.msra.mxu0 %v1268_v5  ;;  %v1277_v24 = vld [vmem:[#allocation2 + $0x720] sm:$0xff]  ;;  %v1278_v0 = vld [vmem:[#allocation2 + $0x388] sm:$0xff] }
 0x17a   :  { %933 = vmatpush2.msra.mxu1 %v1269_v4  ;;  %855 = vmatprep.subr.mxu0 %v1270_v56  ;;  %v1279_v5 = vld [vmem:[#allocation2 + $0x708] sm:$0xff]  ;;  %v1280_v4 = vld [vmem:[#allocation2 + $0x380] sm:$0xff] }
 0x17b   :  { %934 = vmatprep.subr.mxu1 %v1271_v15  ;;  %856 = vmatpush2.msra.mxu0 %v1272_v3  ;;  %v1281_v56 = vld [vmem:[#allocation2 + $0x700] sm:$0xff]  ;;  %v1282_v15 = vld [vmem:[#allocation2 + $0x368] sm:$0xff] }
 0x17c   :  { %935 = vmatpush2.msra.mxu1 %v1273_v10  ;;  %857 = vmatprep.subr.mxu0 %v1274_v2  ;;  %v1283_v3 = vld [vmem:[#allocation2 + $0x6e8] sm:$0xff]  ;;  %v1284_v10 = vld [vmem:[#allocation2 + $0x360] sm:$0xff] }
 0x17d   :  { %936 = vmatprep.subr.mxu1 %v1275_v18  ;;  %858 = vmatpush2.msra.mxu0 %v1276_v28  ;;  %v1285_v2 = vld [vmem:[#allocation2 + $0x6e0] sm:$0xff]  ;;  %v1286_v18 = vld [vmem:[#allocation2 + $0x348] sm:$0xff] }
 0x17e   :  { %937 = vmatpush2.msra.mxu1 %v1277_v24  ;;  %859 = vmatprep.subr.mxu0 %v1278_v0  ;;  %v1287_v28 = vld [vmem:[#allocation2 + $0x6c8] sm:$0xff]  ;;  %v1288_v24 = vld [vmem:[#allocation2 + $0x340] sm:$0xff] }
 0x17f   :  { %938 = vmatprep.subr.mxu1 %v1279_v5  ;;  %860 = vmatpush2.msra.mxu0 %v1280_v4  ;;  %v1289_v0 = vld [vmem:[#allocation2 + $0x6c0] sm:$0xff]  ;;  %v1290_v5 = vld [vmem:[#allocation2 + $0x328] sm:$0xff] }
 0x180   :  { %939 = vmatpush2.msra.mxu1 %v1281_v56  ;;  %861 = vmatprep.subr.mxu0 %v1282_v15  ;;  %v1291_v4 = vld [vmem:[#allocation2 + $0x6a8] sm:$0xff]  ;;  %v1292_v56 = vld [vmem:[#allocation2 + $0x320] sm:$0xff] }
 0x181   :  { %940 = vmatprep.subr.mxu1 %v1283_v3  ;;  %862 = vmatpush2.msra.mxu0 %v1284_v10  ;;  %v1293_v15 = vld [vmem:[#allocation2 + $0x6a0] sm:$0xff]  ;;  %v1294_v3 = vld [vmem:[#allocation2 + $0x308] sm:$0xff] }
 0x182   :  { %941 = vmatpush2.msra.mxu1 %v1285_v2  ;;  %863 = vmatprep.subr.mxu0 %v1286_v18  ;;  %v1295_v10 = vld [vmem:[#allocation2 + $0x688] sm:$0xff]  ;;  %v1296_v2 = vld [vmem:[#allocation2 + $0x300] sm:$0xff] }
 0x183   :  { %942 = vmatprep.subr.mxu1 %v1287_v28  ;;  %864 = vmatpush2.msra.mxu0 %v1288_v24  ;;  %v1297_v18 = vld [vmem:[#allocation2 + $0x680] sm:$0xff]  ;;  %v1298_v28 = vld [vmem:[#allocation2 + $0x2e8] sm:$0xff] }
 0x184   :  { %943 = vmatpush2.msra.mxu1 %v1289_v0  ;;  %865 = vmatprep.subr.mxu0 %v1290_v5  ;;  %v1299_v24 = vld [vmem:[#allocation2 + $0x668] sm:$0xff]  ;;  %v1300_v0 = vld [vmem:[#allocation2 + $0x2e0] sm:$0xff] }
 0x185   :  { %944 = vmatprep.subr.mxu1 %v1291_v4  ;;  %866 = vmatpush2.msra.mxu0 %v1292_v56  ;;  %v1301_v5 = vld [vmem:[#allocation2 + $0x660] sm:$0xff]  ;;  %v1302_v4 = vld [vmem:[#allocation2 + $0x2c8] sm:$0xff] }
 0x186   :  { %945 = vmatpush2.msra.mxu1 %v1293_v15  ;;  %867 = vmatprep.subr.mxu0 %v1294_v3  ;;  %v1303_v56 = vld [vmem:[#allocation2 + $0x648] sm:$0xff]  ;;  %v1304_v15 = vld [vmem:[#allocation2 + $0x2c0] sm:$0xff] }
 0x187   :  { %946 = vmatprep.subr.mxu1 %v1295_v10  ;;  %868 = vmatpush2.msra.mxu0 %v1296_v2  ;;  %v1305_v3 = vld [vmem:[#allocation2 + $0x640] sm:$0xff]  ;;  %v1306_v10 = vld [vmem:[#allocation2 + $0x2a8] sm:$0xff] }
 0x188   :  { %947 = vmatpush2.msra.mxu1 %v1297_v18  ;;  %869 = vmatprep.subr.mxu0 %v1298_v28  ;;  %v1307_v2 = vld [vmem:[#allocation2 + $0x628] sm:$0xff]  ;;  %v1308_v18 = vld [vmem:[#allocation2 + $0x2a0] sm:$0xff] }
 0x189   :  { %948 = vmatprep.subr.mxu1 %v1299_v24  ;;  %870 = vmatpush2.msra.mxu0 %v1300_v0  ;;  %v1309_v28 = vld [vmem:[#allocation2 + $0x620] sm:$0xff]  ;;  %v1310_v24 = vld [vmem:[#allocation2 + $0x288] sm:$0xff] }
 0x18a   :  { %949 = vmatpush2.msra.mxu1 %v1301_v5  ;;  %871 = vmatprep.subr.mxu0 %v1302_v4  ;;  %v1311_v0 = vld [vmem:[#allocation2 + $0x608] sm:$0xff]  ;;  %v1312_v5 = vld [vmem:[#allocation2 + $0x280] sm:$0xff] }
 0x18b   :  { %950 = vmatprep.subr.mxu1 %v1303_v56  ;;  %872 = vmatpush2.msra.mxu0 %v1304_v15  ;;  %v1313_v4 = vld [vmem:[#allocation2 + $0x600] sm:$0xff]  ;;  %v2428_v56 = vld [vmem:[#allocation62_spill] sm:$0xff] }
 0x18c   :  { %951 = vmatpush2.msra.mxu1 %v1305_v3  ;;  %873 = vmatprep.subr.mxu0 %v1306_v10  ;;  %v2429_v15 = vld [vmem:[#allocation63_spill] sm:$0xff]  ;;  %v2430_v3 = vld [vmem:[#allocation64_spill] sm:$0xff]  ;;  %v2431_v10 = vld [vmem:[#allocation65_spill] sm:$0xff] }
 0x18d   :  { %952 = vmatprep.subr.mxu1 %v1307_v2  ;;  %874 = vmatpush2.msra.mxu0 %v1308_v18  ;;  %v2432_v2 = vld [vmem:[#allocation66_spill] sm:$0xff]  ;;  %v2433_v18 = vld [vmem:[#allocation67_spill] sm:$0xff] }
 0x18e   :  { %953 = vmatpush2.msra.mxu1 %v1309_v28  ;;  %875 = vmatprep.subr.mxu0 %v1310_v24  ;;  %v2434_v28 = vld [vmem:[#allocation68_spill] sm:$0xff]  ;;  %v2435_v24 = vld [vmem:[#allocation69_spill] sm:$0xff] }
 0x18f   :  { %954 = vmatprep.subr.mxu1 %v1311_v0  ;;  %876 = vmatpush2.msra.mxu0 %v1312_v5  ;;  %v2436_v0 = vld [vmem:[#allocation70_spill] sm:$0xff]  ;;  %v2437_v5 = vld [vmem:[#allocation71_spill] sm:$0xff] }
 0x190   :  { %955 = vmatpush2.msra.mxu1 %v1313_v4  ;;  %877 = vmatprep.subr.mxu0 %v1459_v25  ;;  %v2379_v25 = vld [vmem:[#allocation13_spill] sm:$0xff]  ;;  %v2438_v4 = vld [vmem:[#allocation72_spill] sm:$0xff] }
 0x191   :  { %957 = vmatmul.mubr.f32.vlgmr.msra.gmra.mxu1 %v1695_v8  ;;  %963 = vmatprep.subr.mxu1 %v1466_v29  ;;  %v2380_v29 = vld [vmem:[#allocation14_spill] sm:$0xff] }
 0x192   :  { %878 = vmatpush2.msra.mxu0 %v1468_v30  ;;  %964 = vmatpush1.msra.mxu1 %v1595_v50  ;;  %v2381_v30 = vld [vmem:[#allocation15_spill] sm:$0xff] }
 0x193   :  { %1027 = vmatprep.mubr.f32.mxu1 %v1704_v14  ;;  %879 = vmatprep.subr.mxu0 %v1474_v33  ;;  %v2382_v33 = vld [vmem:[#allocation16_spill] sm:$0xff]  ;;  %v2389_v50 = vld [vmem:[#allocation23_spill] sm:$0xff]  ;;  %v2415_v14 = vld [vmem:[#allocation49_spill] sm:$0xff] }
 0x194   :  { %965 = vmatprep.subr.mxu1 %v1601_v54  ;;  %880 = vmatpush2.msra.mxu0 %v1480_v35  ;;  %v2383_v35 = vld [vmem:[#allocation17_spill] sm:$0xff]  ;;  %v2390_v54 = vld [vmem:[#allocation24_spill] sm:$0xff] }
 0x195   :  { %966 = vmatpush1.msra.mxu1 %v1605_v57  ;;  %881 = vmatprep.subr.mxu0 %v1487_v38  ;;  %v2384_v38 = vld [vmem:[#allocation18_spill] sm:$0xff]  ;;  %v2391_v57 = vld [vmem:[#allocation25_spill] sm:$0xff] }
 0x196   :  { %967 = vmatprep.subr.mxu1 %v1608_v59  ;;  %882 = vmatpush2.msra.mxu0 %v1494_v42  ;;  %v2385_v42 = vld [vmem:[#allocation19_spill] sm:$0xff]  ;;  %v2392_v59 = vld [vmem:[#allocation26_spill] sm:$0xff] }
 0x197   :  { %968 = vmatpush1.msra.mxu1 %v1613_v63  ;;  %883 = vmatprep.subr.mxu0 %v1503_v45  ;;  %v2386_v45 = vld [vmem:[#allocation20_spill] sm:$0xff]  ;;  %v2393_v63 = vld [vmem:[#allocation27_spill] sm:$0xff] }
 0x198   :  { %969 = vmatprep.subr.mxu1 %v1619_v9  ;;  %884 = vmatpush2.msra.mxu0 %v1507_v46  ;;  %v2387_v46 = vld [vmem:[#allocation21_spill] sm:$0xff]  ;;  %v2394_v9 = vld [vmem:[#allocation28_spill] sm:$0xff] }
 0x199   :  { %970 = vmatpush1.msra.mxu1 %v1622_v11  ;;  %886 = vmatmul.mubr.f32.vlgmr.msra.gmra.mxu0 %v1726_v39  ;;  %v2395_v11 = vld [vmem:[#allocation29_spill] sm:$0xff] }
 0x19a   :  { %971 = vmatprep.subr.mxu1 %v1625_v13  ;;  %1034 = vmatprep.subr.mxu0 %v1510_v48  ;;  %v2388_v48 = vld [vmem:[#allocation22_spill] sm:$0xff] }
 0x19b   :  { %972 = vmatpush1.msra.mxu1 %v1637_v20  ;;  %1035 = vmatpush1.msra.mxu0 %v1639_v21  ;;  %v2396_v13 = vld [vmem:[#allocation30_spill] sm:$0xff]  ;;  %v2397_v20 = vld [vmem:[#allocation31_spill] sm:$0xff]  ;;  %v2398_v21 = vld [vmem:[#allocation32_spill] sm:$0xff] }
 0x19c   :  { %1189 = vmatprep.mubr.msk.f32.mxu0 %vm102_vm1, %v1664_v44  ;;  %973 = vmatprep.subr.mxu1 %v1643_v23  ;;  %v2399_v23 = vld [vmem:[#allocation33_spill] sm:$0xff]  ;;  %v2404_v44 = vld [vmem:[#allocation38_spill] sm:$0xff] }
 0x19d   :  { %1036 = vmatprep.subr.mxu0 %v1645_v26  ;;  %974 = vmatpush1.msra.mxu1 %v1652_v37  ;;  %v2400_v26 = vld [vmem:[#allocation34_spill] sm:$0xff]  ;;  %v2401_v37 = vld [vmem:[#allocation35_spill] sm:$0xff] }
 0x19e   :  { %1037 = vmatpush1.msra.mxu0 %v1656_v40  ;;  %975 = vmatprep.subr.mxu1 %v1658_v41  ;;  %v2402_v40 = vld [vmem:[#allocation36_spill] sm:$0xff]  ;;  %v2403_v41 = vld [vmem:[#allocation37_spill] sm:$0xff] }
 0x19f   :  { %1038 = vmatprep.subr.mxu0 %v1668_v17  ;;  %976 = vmatpush1.msra.mxu1 %v1670_v47  ;;  %v2405_v17 = vld [vmem:[#allocation39_spill] sm:$0xff]  ;;  %v2406_v47 = vld [vmem:[#allocation40_spill] sm:$0xff] }
 0x1a0   :  { %1039 = vmatpush1.msra.mxu0 %v1677_v19  ;;  %977 = vmatprep.subr.mxu1 %v1679_v53  ;;  %v2407_v19 = vld [vmem:[#allocation41_spill] sm:$0xff]  ;;  %v2408_v53 = vld [vmem:[#allocation42_spill] sm:$0xff] }
 0x1a1   :  { %1040 = vmatprep.subr.mxu0 %v1683_v58  ;;  %978 = vmatpush1.msra.mxu1 %v1686_v60  ;;  %v2409_v58 = vld [vmem:[#allocation43_spill] sm:$0xff]  ;;  %v2410_v60 = vld [vmem:[#allocation44_spill] sm:$0xff] }
 0x1a2   :  { %1041 = vmatpush1.msra.mxu0 %v1690_v61  ;;  %979 = vmatprep.subr.mxu1 %v1692_v62  ;;  %v2411_v61 = vld [vmem:[#allocation45_spill] sm:$0xff]  ;;  %v2412_v62 = vld [vmem:[#allocation46_spill] sm:$0xff] }
 0x1a3   :  { %1042 = vmatprep.subr.mxu0 %v1699_v12  ;;  %980 = vmatpush1.msra.mxu1 %v1701_v36  ;;  %v2413_v12 = vld [vmem:[#allocation47_spill] sm:$0xff]  ;;  %v2414_v36 = vld [vmem:[#allocation48_spill] sm:$0xff] }
 0x1a4   :  { %1043 = vmatpush1.msra.mxu0 %v1709_v31  ;;  %981 = vmatprep.subr.mxu1 %v1711_v16  ;;  %v2416_v31 = vld [vmem:[#allocation50_spill] sm:$0xff]  ;;  %v2417_v16 = vld [vmem:[#allocation51_spill] sm:$0xff] }
 0x1a5   :  { %1044 = vmatprep.subr.mxu0 %v1715_v27  ;;  %982 = vmatpush1.msra.mxu1 %v1717_v32  ;;  %v2418_v27 = vld [vmem:[#allocation52_spill] sm:$0xff]  ;;  %v2419_v32 = vld [vmem:[#allocation53_spill] sm:$0xff] }
 0x1a6   :  { %1045 = vmatpush1.msra.mxu0 %v1721_v51  ;;  %983 = vmatprep.subr.mxu1 %v1723_v34  ;;  %v2420_v51 = vld [vmem:[#allocation54_spill] sm:$0xff]  ;;  %v2421_v34 = vld [vmem:[#allocation55_spill] sm:$0xff] }
 0x1a7   :  { %1046 = vmatprep.subr.mxu0 %v1730_v43  ;;  %984 = vmatpush1.msra.mxu1 %v1732_v7  ;;  %v2422_v43 = vld [vmem:[#allocation56_spill] sm:$0xff]  ;;  %v2423_v7 = vld [vmem:[#allocation57_spill] sm:$0xff] }
 0x1a8   :  { %1047 = vmatpush1.msra.mxu0 %v1736_v49  ;;  %985 = vmatprep.subr.mxu1 %v1738_v52  ;;  %v2424_v49 = vld [vmem:[#allocation58_spill] sm:$0xff]  ;;  %v2425_v52 = vld [vmem:[#allocation59_spill] sm:$0xff] }
 0x1a9   :  { %1048 = vmatprep.subr.mxu0 %v1742_v6  ;;  %986 = vmatpush1.msra.mxu1 %v1744_v55  ;;  %v2426_v6 = vld [vmem:[#allocation60_spill] sm:$0xff]  ;;  %v2427_v55 = vld [vmem:[#allocation61_spill] sm:$0xff] }
 0x1aa   :  { %1049 = vmatpush1.msra.mxu0 %v2379_v25  ;;  %987 = vmatprep.subr.mxu1 %v2380_v29  ;;  %v2439_v25 = vld [vmem:[#allocation73_spill] sm:$0xff]  ;;  %v2440_v29 = vld [vmem:[#allocation74_spill] sm:$0xff] }
 0x1ab   :  { %1050 = vmatprep.subr.mxu0 %v2381_v30  ;;  %988 = vmatpush1.msra.mxu1 %v2382_v33  ;;  %v2441_v30 = vld [vmem:[#allocation75_spill] sm:$0xff]  ;;  %v2442_v33 = vld [vmem:[#allocation76_spill] sm:$0xff] }
 0x1ac   :  { %1051 = vmatpush1.msra.mxu0 %v2383_v35  ;;  %989 = vmatprep.subr.mxu1 %v2384_v38  ;;  %v2443_v35 = vld [vmem:[#allocation77_spill] sm:$0xff]  ;;  %v2444_v38 = vld [vmem:[#allocation78_spill] sm:$0xff] }
 0x1ad   :  { %1052 = vmatprep.subr.mxu0 %v2385_v42  ;;  %990 = vmatpush1.msra.mxu1 %v2386_v45  ;;  %v2445_v42 = vld [vmem:[#allocation79_spill] sm:$0xff]  ;;  %v2446_v45 = vld [vmem:[#allocation80_spill] sm:$0xff] }
 0x1ae   :  { %1053 = vmatpush1.msra.mxu0 %v2387_v46  ;;  %991 = vmatprep.subr.mxu1 %v2388_v48  ;;  %v2447_v46 = vld [vmem:[#allocation81_spill] sm:$0xff]  ;;  %v2448_v48 = vld [vmem:[#allocation82_spill] sm:$0xff] }
 0x1af   :  { %1054 = vmatprep.subr.mxu0 %v2389_v50  ;;  %992 = vmatpush1.msra.mxu1 %v2390_v54  ;;  %v2449_v50 = vld [vmem:[#allocation83_spill] sm:$0xff]  ;;  %v2450_v54 = vld [vmem:[#allocation84_spill] sm:$0xff] }
 0x1b0   :  { %1055 = vmatpush1.msra.mxu0 %v2391_v57  ;;  %993 = vmatprep.subr.mxu1 %v2392_v59  ;;  %v2451_v57 = vld [vmem:[#allocation85_spill] sm:$0xff]  ;;  %v2452_v59 = vld [vmem:[#allocation86_spill] sm:$0xff] }
 0x1b1   :  { %1056 = vmatprep.subr.mxu0 %v2393_v63  ;;  %994 = vmatpush1.msra.mxu1 %v2394_v9  ;;  %v2453_v63 = vld [vmem:[#allocation87_spill] sm:$0xff]  ;;  %v2454_v9 = vld [vmem:[#allocation88_spill] sm:$0xff] }
 0x1b2   :  { %1057 = vmatpush1.msra.mxu0 %v2395_v11  ;;  %995 = vmatprep.subr.mxu1 %v2396_v13  ;;  %v2455_v11 = vld [vmem:[#allocation89_spill] sm:$0xff]  ;;  %v2456_v13 = vld [vmem:[#allocation90_spill] sm:$0xff] }
 0x1b3   :  { %1058 = vmatprep.subr.mxu0 %v2397_v20  ;;  %996 = vmatpush2.msra.mxu1 %v2398_v21  ;;  %v2457_v20 = vld [vmem:[#allocation91_spill] sm:$0xff]  ;;  %v2460_v21 = vld [vmem:[#allocation94_spill] sm:$0xff] }
 0x1b4   :  { %1059 = vmatpush1.msra.mxu0 %v2399_v23  ;;  %997 = vmatprep.subr.mxu1 %v2400_v26  ;;  %v2461_v23 = vld [vmem:[#allocation95_spill] sm:$0xff]  ;;  %v2462_v26 = vld [vmem:[#allocation96_spill] sm:$0xff] }
 0x1b5   :  { %1060 = vmatprep.subr.mxu0 %v2401_v37  ;;  %998 = vmatpush2.msra.mxu1 %v2402_v40  ;;  %v2463_v37 = vld [vmem:[#allocation97_spill] sm:$0xff] }
 0x1b6   :  { %1061 = vmatpush1.msra.mxu0 %v2403_v41  ;;  %999 = vmatprep.subr.mxu1 %v2404_v44  ;;  %v492_v41 = vld [vmem:[%s2191_s5] sm:$0xf]  ;;  %s1363_s5 = smov [#allocation5]  }
 0x1b7   :  { %1062 = vmatprep.subr.mxu0 %v2405_v17  ;;  %1000 = vmatpush2.msra.mxu1 %v2406_v47  ;;  %v2465_v47 = vld [vmem:[#allocation12_spill] sm:$0xff] }
 0x1b8   :  { %1063 = vmatpush1.msra.mxu0 %v2407_v19  ;;  %1001 = vmatprep.subr.mxu1 %v2408_v53  ;;  %v497_v19 = vrot.slane %v492_v41, %v2465_v47 }
 0x1b9   :  { %1064 = vmatprep.subr.mxu0 %v2409_v58  ;;  %1002 = vmatpush2.msra.mxu1 %v2410_v60 }
 0x1ba   :  { %1065 = vmatpush1.msra.mxu0 %v2411_v61  ;;  %1003 = vmatprep.subr.mxu1 %v2412_v62 }
 0x1bb   :  { %1187 = vmatprep.subr.msk.mxu0 %vm517_vm0, %v2413_v12  ;;  %1004 = vmatpush2.msra.mxu1 %v2414_v36 }
 0x1bc   :  { %1188 = vmatpush2.msk.msra.mxu0 %vm517_vm0, %v2415_v14  ;;  %1005 = vmatprep.subr.mxu1 %v2416_v31  ;;  %v2466_v14 = vld [vmem:[#allocation9_spill] sm:$0xff] }
 0x1bd   :  { %1070 = vmatprep.subr.mxu0 %v2417_v16  ;;  %1006 = vmatpush2.msra.mxu1 %v2418_v27  ;;  %v505_v31 = vrot.slane %v492_v41, %v2466_v14 }
 0x1be   :  { %1071 = vmatpush2.msra.mxu0 %v2419_v32  ;;  %1007 = vmatprep.subr.mxu1 %v2420_v51  ;;  %v2467_v32 = vld [vmem:[#allocation11_spill] sm:$0xff] }
 0x1bf   :  { %1072 = vmatprep.subr.mxu0 %v2421_v34  ;;  %1008 = vmatpush2.msra.mxu1 %v2422_v43  ;;  %v509_v51 = vrot.slane %v492_v41, %v2467_v32 }
 0x1c0   :  { %1073 = vmatpush2.msra.mxu0 %v2423_v7  ;;  %1009 = vmatprep.subr.mxu1 %v2424_v49 }
 0x1c1   :  { %1074 = vmatprep.subr.mxu0 %v2425_v52  ;;  %1010 = vmatpush2.msra.mxu1 %v2426_v6 }
 0x1c2   :  { %1075 = vmatpush2.msra.mxu0 %v2427_v55  ;;  %1011 = vmatprep.subr.mxu1 %v2428_v56 }
 0x1c3   :  { %1076 = vmatprep.subr.mxu0 %v2429_v15  ;;  %1012 = vmatpush2.msra.mxu1 %v2430_v3 }
 0x1c4   :  { %1077 = vmatpush2.msra.mxu0 %v2431_v10  ;;  %1013 = vmatprep.subr.mxu1 %v2432_v2 }
 0x1c5   :  { %1078 = vmatprep.subr.mxu0 %v2433_v18  ;;  %1014 = vmatpush2.msra.mxu1 %v2434_v28 }
 0x1c6   :  { %1079 = vmatpush2.msra.mxu0 %v2435_v24  ;;  %1015 = vmatprep.subr.mxu1 %v2436_v0 }
 0x1c7   :  { %1080 = vmatprep.subr.mxu0 %v2437_v5  ;;  %1016 = vmatpush2.msra.mxu1 %v2438_v4 }
 0x1c8   :  { %1081 = vmatpush2.msra.mxu0 %v2439_v25  ;;  %1017 = vmatprep.subr.mxu1 %v2440_v29 }
 0x1c9   :  { %1082 = vmatprep.subr.mxu0 %v2441_v30  ;;  %1018 = vmatpush2.msra.mxu1 %v2442_v33 }
 0x1ca   :  { %1083 = vmatpush2.msra.mxu0 %v2443_v35  ;;  %1019 = vmatprep.subr.mxu1 %v2444_v38 }
 0x1cb   :  { %1084 = vmatprep.subr.mxu0 %v2445_v42  ;;  %1020 = vmatpush2.msra.mxu1 %v2446_v45 }
 0x1cc   :  { %1085 = vmatpush2.msra.mxu0 %v2447_v46  ;;  %1021 = vmatprep.subr.mxu1 %v2448_v48 }
 0x1cd   :  { %1086 = vmatprep.subr.mxu0 %v1960_v22  ;;  %1022 = vmatpush2.msra.mxu1 %v2449_v50  ;;  %v2458_v22 = vld [vmem:[#allocation92_spill] sm:$0xff] }
 0x1ce   :  { %1087 = vmatpush2.msra.mxu0 %v1966_v1  ;;  %1023 = vmatprep.subr.mxu1 %v2450_v54  ;;  %v2459_v1 = vld [vmem:[#allocation93_spill] sm:$0xff] }
 0x1cf   :  { %1088 = vmatprep.subr.mxu0 %v2451_v57  ;;  %1024 = vmatpush2.msra.mxu1 %v2452_v59 }
 0x1d0   :  { %1089 = vmatpush2.msra.mxu0 %v2453_v63  ;;  %1025 = vmatprep.subr.mxu1 %v2454_v9  ;;  %v667_v53 = vpop.f32.mrf.mxu1 }
 0x1d1   :  { %1090 = vmatprep.subr.mxu0 %v2455_v11  ;;  %1026 = vmatpush2.msra.mxu1 %v2456_v13 }
 0x1d2   :  { %1091 = vmatpush2.msra.mxu0 %v2457_v20  ;;  %1028 = vmatmul.mubr.f32.vlgmr.msra.gmra.mxu1 %v1726_v39  ;;  %v2464_v39 = vld [vmem:[#allocation10_spill] sm:$0xff]  ;;  %v669_v61 = vpop.f32.mrf.mxu1 }
 0x1d3   :  { %1092 = vmatprep.subr.mxu0 %v2458_v22  ;;  %v501_v44 = vrot.slane %v492_v41, %v2464_v39 }
 0x1d4   :  { %1093 = vmatpush2.msra.mxu0 %v2459_v1 }
 0x1d5   :  { %1094 = vmatprep.subr.mxu0 %v2460_v21 }
 0x1d6   :  { %1095 = vmatpush2.msra.mxu0 %v2461_v23 }
 0x1d7   :  { %1096 = vmatprep.subr.mxu0 %v2462_v26 }
 0x1d8   :  { %1097 = vmatpush2.msra.mxu0 %v2463_v37  ;;  %v596_v40 = vpop.f32.mrf.mxu0 }
 0x1d9   :  { %1099 = vmatmul.mubr.f32.vlgmr.msra.gmra.mxu0 %v1695_v8  ;;  %v597_v60 = vadd.f32 %v596_v40, %v497_v19  ;;  %v1109_v8 = vld [vmem:[%s2192_s6] sm:$0xf]  ;;  %s1168_s6 = sshll.u32 %s1363_s5, 4  ;;  %s1169_s6 = int_to_ptr.vmem [resolvable:$true] %s1168_s6 }
 0x1da   :  { %v598_v17 = vpop.f32.mrf.mxu0  ;;  %v1118_v27 = vrot.slane %v1109_v8, %v2464_v39  ;;  %v1114_v7 = vrot.slane %v1109_v8, %v2465_v47  ;;  %v1122_v15 = vrot.slane %v1109_v8, %v2466_v14  ;;  %v1126_v28 = vrot.slane %v1109_v8, %v2467_v32  ;;  %s1334_s12 = scalar_lea.vmem %s1169_s6, 16  ;;  %s1338_s13 = scalar_lea.vmem %s1169_s6, 32 }
 0x1db   :  { %v599_v58 = vadd.f32 %v598_v17, %v501_v44  ;;  %v668_v36 = vadd.f32 %v667_v53, %v597_v60  ;;  %p1335_p5 = scmp.ne.s32.totalorder %s1169_s6, %s1334_s12  ;;  %p1339_p6 = scmp.lt.s32.totalorder %s1169_s6, %s1169_s6 }
 0x1dc   :  { %p1340_p7 = scmp.lt.s32.totalorder %s1338_s13, %s1334_s12 }
 0x1dd   :  { %v670_v62 = vadd.f32 %v669_v61, %v599_v58  ;;  %v814_v43 = vmax.f32 %v668_v36, 0.0  ;;  %v2469_v58 = vld [vmem:[#allocation8_spill] sm:$0xff] }
 0x1de   :  { %p1341_p8 = por %p1340_p7, %p1339_p6 }
 0x1df   :  { %v815_v16 = vmax.f32 %v670_v62, 0.0  ;;  %v1131_v10 = vmul.f32 %v1114_v7, %v814_v43 }
 0x1e0   :  { %p1342_p9 = pnand %p1341_p8, %p1335_p5 }
 0x1e1   :  { %v1132_v6 = vmul.f32 %v1118_v27, %v815_v16 }
 0x1e3   :  { %v1135_v5 = vadd.f32 %v1132_v6, %v1131_v10 }
 0x210   :  { %v738_v12 = vpop.f32.mrf.mxu1 }
 0x211   :  { %v739_v49 = vadd.f32 %v738_v12, %v505_v31 }
 0x212   :  { %v740_v34 = vpop.f32.mrf.mxu1 }
 0x213   :  { %v741_v55 = vadd.f32 %v740_v34, %v509_v51 }
 0x217   :  { %v809_v52 = vpop.f32.mrf.mxu0 }
 0x218   :  { %v810_v56 = vadd.f32 %v809_v52, %v739_v49 }
 0x219   :  { %v811_v3 = vpop.f32.mrf.mxu0 }
 0x21a   :  { %v816_v2 = vmax.f32 %v810_v56, 0.0  ;;  %v812_v18 = vadd.f32 %v811_v3, %v741_v55 }
 0x21c   :  { %v1133_v24 = vmul.f32 %v1122_v15, %v816_v2  ;;  %v817_v0 = vmax.f32 %v812_v18, 0.0 }
 0x21e   :  { %v1134_v4 = vmul.f32 %v1126_v28, %v817_v0  ;;  %v1136_v25 = vadd.f32 %v1135_v5, %v1133_v24 }
 0x220   :  { %v1137_v29 = vsel %vm102_vm1, %v1134_v4, 0.0 }
 0x221   :  { %v1138_v30 = vadd.f32 %v1137_v29, %v1136_v25 }
 0x223   :  { %1139 = vadd.xlane.f32.xlu1 %v1138_v30 }
 0x251   :  { %v958_v38 = vpop.f32.mrf.mxu1 }
 0x253   :  { %v960_v46 = vpop.f32.mrf.mxu1 }
 0x259   :  { %v887_v33 = vpop.f32.mrf.mxu0 }
 0x25a   :  { %v888_v45 = vadd.f32 %v887_v33, %v497_v19  ;;  %v2468_v19 = vlaneseq }
 0x25b   :  { %v889_v35 = vpop.f32.mrf.mxu0 }
 0x25c   :  { %v890_v42 = vadd.f32 %v889_v35, %v501_v44  ;;  %v959_v54 = vadd.f32 %v958_v38, %v888_v45  ;;  %v1154_v53 = vand.u32 127, %v2468_v19 }
 0x25e   :  { %v961_v48 = vadd.f32 %v960_v46, %v890_v42  ;;  %v1105_v63 = vmax.f32 %v959_v54, 0.0  ;;  %v1157_v60 = vsub.s32 %v1154_v53, %v2469_v58 }
 0x260   :  { %v1106_v57 = vmax.f32 %v961_v48, 0.0  ;;  %v1141_v21 = vmul.f32 %v1114_v7, %v1105_v63 }
 0x262   :  { %v1142_v13 = vmul.f32 %v1118_v27, %v1106_v57 }
 0x264   :  { %v1145_v41 = vadd.f32 %v1142_v13, %v1141_v21 }
 0x292   :  { %v1029_v50 = vpop.f32.mrf.mxu1 }
 0x293   :  { %v1030_v9 = vadd.f32 %v1029_v50, %v505_v31 }
 0x294   :  { %v1031_v59 = vpop.f32.mrf.mxu1 }
 0x295   :  { %v1032_v20 = vadd.f32 %v1031_v59, %v509_v51 }
 0x299   :  { %v1100_v11 = vpop.f32.mrf.mxu0 }
 0x29a   :  { %v1101_v22 = vadd.f32 %v1100_v11, %v1030_v9 }
 0x29b   :  { %v1102_v1 = vpop.f32.mrf.mxu0 }
 0x29c   :  { %v1107_v23 = vmax.f32 %v1101_v22, 0.0  ;;  %v1103_v26 = vadd.f32 %v1102_v1, %v1032_v20 }
 0x29e   :  { %v1143_v37 = vmul.f32 %v1122_v15, %v1107_v23  ;;  %v1108_v40 = vmax.f32 %v1103_v26, 0.0 }
 0x2a0   :  { %v1144_v39 = vmul.f32 %v1126_v28, %v1108_v40  ;;  %v1146_v44 = vadd.f32 %v1145_v41, %v1143_v37 }
 0x2a2   :  { %v1147_v17 = vsel %vm102_vm1, %v1144_v39, 0.0 }
 0x2a3   :  { %v1148_v47 = vadd.f32 %v1147_v17, %v1146_v44 }
 0x2a5   :  { %1149 = vadd.xlane.f32.xlu0 %v1148_v47 }
 0x2ac   :  { %v1140_v61 = vpop.xlane.xlu1 %1139 }
 0x32e   :  { %v1150_v62 = vpop.xlane.xlu0 %1149 }
 0x32f   :  { %v1151_v12 = vsub.f32 %v1140_v61, %v1150_v62 }
 0x331   :  { %v1158_v36 = vrot.slane %v1151_v12, %v1157_v60 }
 0x333   :  { %1161 = vst.msk [vmem:[#allocation5] sm:$0x1] %vm1160_vm3, %v1158_v36 }
 0x334   :  { %1345 = shalt.err (!%p1342_p9)
}
 0x335   :  { %1171 = dma.vmem_to_hbm [thread:$0]  %s1169_s6, 16, %s2193_s7, [#allocation4]  }
 0x336   :  { %1356 = dma.done.wait [#allocation4], 16  }
 0x337   :  { %1357 = vsyncadd [#allocation4], 4294967280 }
 0x338   :  { %1175 = vsyncpa [#allocation3], 1 }
 0x339   :  { %1176 = vsyncpa [#allocation4], 1 }

</bundles_post_ra>
